<compile_context>
chip_gen: v7x
topology: tpu7x:2x2x1
jax: 0.10.0
libtpu: 0.0.40
codegen_flags: <defaults>
</compile_context>

<pallas_src>
import math

import jax
import jax.numpy as jnp
from jax import lax
from jax.experimental import pallas as pl
from jax.experimental.pallas import tpu as pltpu

# ---------------- config (small, TPU-friendly shapes) ----------------
DIM = 128                 # model dim (lane-aligned)
HEADS = 4
DIM_HEAD = DIM // HEADS   # 32
FF = 4 * DIM              # 512
DEPTH = 2
MAX_MORPHO_LEN = 12
NUM_TIME_EMBEDS = 1
NUM_MOL_EMBEDS = 1
NUM_MORPHO_EMBEDS = 1
# sequence = morpho_encodings + morpho_embed + time_embed + mol_embed + learned_query
SEQ = MAX_MORPHO_LEN + NUM_MORPHO_EMBEDS + NUM_TIME_EMBEDS + NUM_MOL_EMBEDS + 1  # 16


# ---------------- in-kernel helpers ----------------
def _ln(x, g, eps=1e-5):
    # LayerNorm over last dim, scale-only gain (DALLE2-style LayerNorm), f32 stats.
    # TODO(synk): torch.nn.LayerNorm has a learnable bias; the reference net uses
    # DALLE2's scale-only LayerNorm, which is what is implemented here.
    mean = jnp.mean(x, axis=-1, keepdims=True)
    var = jnp.mean((x - mean) ** 2, axis=-1, keepdims=True)
    return (x - mean) * lax.rsqrt(var + eps) * g


def _prior_kernel(tok_ref, ln1_ref, wqkv_ref, wo_ref, ln2_ref, wff1_ref, wff2_ref,
                  nfin_ref, wproj_ref, o_ref, x_ref):
    """One pre-LN causal transformer block per grid step (grid = (DEPTH,)).

    Per-layer bf16 weights stream through the Pallas pipeline (layer l+1 DMA
    overlaps layer l compute); the f32 residual stream persists in VMEM scratch.
    """
    l = pl.program_id(0)
    B, S, D = x_ref.shape

    @pl.when(l == 0)
    def _():
        x_ref[...] = tok_ref[...].astype(jnp.float32)

    x = x_ref[...]                                      # (B, S, D) f32 residual

    # Causal additive mask (tiny iota, rebuilt per layer step).
    row = lax.broadcasted_iota(jnp.int32, (S, S), 0)
    col = lax.broadcasted_iota(jnp.int32, (S, S), 1)
    neg_mask = jnp.where(col > row, -1e30, 0.0).astype(jnp.float32)   # (S, S)

    # ---- causal multi-head self-attention (pre-LN) ----
    h = _ln(x, ln1_ref[...])                            # f32
    h2d = h.reshape(B * S, D).astype(jnp.bfloat16)      # fold batch into matmul M axis
    # NOTE: 1/sqrt(DIM_HEAD) is folded into the Q columns of w_qkv at init time.
    qkv = jnp.dot(h2d, wqkv_ref[...],
                  preferred_element_type=jnp.float32)   # (B*S, 3D), bf16 MXU, f32 acc

    def split_heads(m2d):                               # (B*S, H*Dh) -> (H*B, S, Dh)
        parts = [m2d[:, hd * DIM_HEAD:(hd + 1) * DIM_HEAD].reshape(B, S, DIM_HEAD)
                 for hd in range(HEADS)]
        return jnp.concatenate(parts, axis=0)           # head-major leading dim

    q = split_heads(qkv[:, :D])
    k = split_heads(qkv[:, D:2 * D])
    v = split_heads(qkv[:, 2 * D:])

    # One batched score matmul + ONE softmax over all (head, batch) pairs.
    sim = jnp.einsum('nqd,nkd->nqk', q, k,
                     preferred_element_type=jnp.float32)        # (H*B, S, S)
    sim = sim + neg_mask[None]
    m = jnp.max(sim, axis=-1, keepdims=True)
    p = jnp.exp(sim - m)
    attn = p / jnp.sum(p, axis=-1, keepdims=True)               # exact softmax
    out_h = jnp.einsum('nqk,nkd->nqd', attn, v,
                       preferred_element_type=jnp.float32)      # (H*B, S, Dh)

    # Merge heads back onto lanes: (H*B, S, Dh) -> (B*S, D), then one Wo matmul.
    attn2d = jnp.concatenate(
        [out_h[hd * B:(hd + 1) * B].reshape(B * S, DIM_HEAD) for hd in range(HEADS)],
        axis=-1)
    attn2d = jnp.dot(attn2d.astype(jnp.bfloat16), wo_ref[...],
                     preferred_element_type=jnp.float32)
    x = x + attn2d.reshape(B, S, D)

    # ---- feed-forward (pre-LN, GELU, no bias) ----
    hf = _ln(x, ln2_ref[...]).reshape(B * S, D).astype(jnp.bfloat16)
    y = jnp.dot(hf, wff1_ref[...], preferred_element_type=jnp.float32)
    # TODO(synk): PyTorch nn.GELU defaults to the exact erf form; the tanh
    # approximation is used here (small numeric difference).
    y = jax.nn.gelu(y)
    y = jnp.dot(y.astype(jnp.bfloat16), wff2_ref[...],
                preferred_element_type=jnp.float32)
    x = x + y.reshape(B, S, D)

    x_ref[...] = x                                      # carry residual to next layer

    # ---- final LayerNorm + projection, only for the learned-query (last) token ----
    @pl.when(l == pl.num_programs(0) - 1)
    def _():
        x_last = x[:, S - 1, :]                         # (B, D)
        h_last = _ln(x_last, nfin_ref[...]).astype(jnp.bfloat16)
        o_ref[...] = jnp.dot(h_last, wproj_ref[...],
                             preferred_element_type=jnp.float32).astype(o_ref.dtype)


# ---------------- pallas_call wrapper ----------------
def causal_transformer(tokens, params):
    """Fused transformer: tokens (B, S, D) -> pred_mol_embed (B, D)."""
    B, S, D = tokens.shape
    args = (tokens,
            params["ln1_g"], params["w_qkv"], params["w_o"],
            params["ln2_g"], params["w_ff1"], params["w_ff2"],
            params["final_norm_g"], params["proj_out_w"])
    in_specs = [
        pl.BlockSpec((B, S, D), lambda l: (0, 0, 0)),           # tokens (resident)
        pl.BlockSpec((None, 1, D), lambda l: (l, 0, 0)),        # ln1_g[l]
        pl.BlockSpec((None, D, 3 * D), lambda l: (l, 0, 0)),    # w_qkv[l]  (bf16)
        pl.BlockSpec((None, D, D), lambda l: (l, 0, 0)),        # w_o[l]    (bf16)
        pl.BlockSpec((None, 1, D), lambda l: (l, 0, 0)),        # ln2_g[l]
        pl.BlockSpec((None, D, FF), lambda l: (l, 0, 0)),       # w_ff1[l]  (bf16)
        pl.BlockSpec((None, FF, D), lambda l: (l, 0, 0)),       # w_ff2[l]  (bf16)
        pl.BlockSpec((1, D), lambda l: (0, 0)),                 # final_norm_g
        pl.BlockSpec((D, D), lambda l: (0, 0)),                 # proj_out_w (bf16)
    ]
    return pl.pallas_call(
        _prior_kernel,
        out_shape=jax.ShapeDtypeStruct((B, D), tokens.dtype),
        grid=(DEPTH,),
        in_specs=in_specs,
        out_specs=pl.BlockSpec((B, D), lambda l: (0, 0)),       # written on last step
        scratch_shapes=[pltpu.VMEM((B, S, D), jnp.float32)],    # residual stream
        compiler_params=pltpu.CompilerParams(
            dimension_semantics=("arbitrary",)),                # depth is sequential
    )(*args)


# ---------------- plain-JAX glue (matches the PyTorch forward) ----------------
def sinusoidal_pos_emb(t, dim):
    half = dim // 2
    emb = math.log(10000.0) / (half - 1)
    freqs = jnp.exp(jnp.arange(half, dtype=jnp.float32) * -emb)
    args = t[:, None] * freqs[None, :]
    return jnp.concatenate([jnp.sin(args), jnp.cos(args)], axis=-1)


def time_mlp(te, p):
    # MLP(dim, dim*num_time_embeds), expansion_factor=2, depth=2, SiLU
    h = jax.nn.silu(te @ p["tw0"] + p["tb0"])
    h = jax.nn.silu(h @ p["tw1"] + p["tb1"])
    return h @ p["tw2"] + p["tb2"]


def prob_mask_like(shape, prob, key):
    if prob == 1.0:
        return jnp.ones(shape, dtype=bool)
    if prob == 0.0:
        return jnp.zeros(shape, dtype=bool)
    return jax.random.uniform(key, shape) < prob


def img2mol_prior_forward(params, mol_embed, diffusion_timesteps, *,
                          morpho_embed, morpho_encodings=None,
                          morpho_cond_drop_prob=0.0, mol_cond_drop_prob=0.0):
    batch, dim = mol_embed.shape
    dtype = mol_embed.dtype

    # to_morpho_embeds / to_mol_embeds: Identity + 'b (n d) -> b n d' with n=1
    morpho_embed_t = morpho_embed.reshape(batch, NUM_MORPHO_EMBEDS, dim)
    mol_embed_t = mol_embed.reshape(batch, NUM_MOL_EMBEDS, dim)

    kmask = jax.random.PRNGKey(1234)
    morpho_keep = prob_mask_like((batch,), 1.0 - morpho_cond_drop_prob, kmask)[:, None, None]
    mol_keep = prob_mask_like((batch,), 1.0 - mol_cond_drop_prob, kmask)[:, None, None]

    if morpho_encodings is None:
        morpho_encodings = jnp.zeros((batch, 0, dim), dtype=dtype)
    mask = jnp.any(morpho_encodings != 0.0, axis=-1)

    morpho_encodings = morpho_encodings[:, :MAX_MORPHO_LEN]
    mask = mask[:, :MAX_MORPHO_LEN]
    remainder = MAX_MORPHO_LEN - morpho_encodings.shape[1]
    if remainder > 0:
        morpho_encodings = jnp.pad(morpho_encodings,
                                   ((0, 0), (0, remainder), (0, 0)))
        mask = jnp.pad(mask, ((0, 0), (0, remainder)), constant_values=False)

    morpho_encodings = jnp.where(mask[:, :, None] & morpho_keep,
                                 morpho_encodings,
                                 params["null_morpho_encodings"].astype(dtype))
    morpho_embed_t = jnp.where(morpho_keep, morpho_embed_t,
                               params["null_morpho_embeds"].astype(dtype))
    mol_embed_t = jnp.where(mol_keep, mol_embed_t,
                            params["null_mol_embed"].astype(dtype))

    # continuous time embedding: SinusoidalPosEmb -> MLP -> (b, 1, d)
    t = diffusion_timesteps.astype(dtype)
    time_embed = time_mlp(sinusoidal_pos_emb(t, dim), params)
    time_embed = time_embed.reshape(batch, NUM_TIME_EMBEDS, dim)

    learned_queries = jnp.broadcast_to(
        params["learned_query"][None, None, :], (batch, 1, dim)).astype(dtype)

    tokens = jnp.concatenate(
        (morpho_encodings, morpho_embed_t, time_embed, mol_embed_t, learned_queries),
        axis=1)                                        # (B, SEQ, D)

    # ---- fused causal transformer (single Pallas kernel, grid over DEPTH) ----
    # TODO(synk): for CFG sampling (forward_with_cond_scale), stack the cond/uncond
    # pair on the batch axis before calling this to amortize one weight DMA per step.
    return causal_transformer(tokens, params)          # pred_mol_embed (B, D)


# ---------------- deterministic parameter init ----------------
def init_params(key):
    keys = iter(jax.random.split(key, 64))

    def nrm(shape, scale=0.02):
        return jax.random.normal(next(keys), shape, dtype=jnp.float32) * scale

    # fused Q|K|V projection; fold the 1/sqrt(DIM_HEAD) attention scale into the
    # Q columns so the kernel never multiplies by the scale at runtime.
    w_qkv = nrm((DEPTH, DIM, 3 * DIM))
    w_qkv = w_qkv.at[:, :, :DIM].multiply(DIM_HEAD ** -0.5)

    params = {
        "learned_query": jax.random.normal(next(keys), (DIM,), jnp.float32),
        "null_morpho_encodings": jax.random.normal(next(keys), (1, MAX_MORPHO_LEN, DIM), jnp.float32),
        "null_morpho_embeds": jax.random.normal(next(keys), (1, NUM_MORPHO_EMBEDS, DIM), jnp.float32),
        "null_mol_embed": jax.random.normal(next(keys), (1, DIM), jnp.float32),
        # time MLP: Linear(D,2D)+SiLU, Linear(2D,2D)+SiLU, Linear(2D,D)
        "tw0": nrm((DIM, 2 * DIM)), "tb0": jnp.zeros((2 * DIM,), jnp.float32),
        "tw1": nrm((2 * DIM, 2 * DIM)), "tb1": jnp.zeros((2 * DIM,), jnp.float32),
        "tw2": nrm((2 * DIM, DIM * NUM_TIME_EMBEDS)),
        "tb2": jnp.zeros((DIM * NUM_TIME_EMBEDS,), jnp.float32),
        # transformer: per-layer stacked weights; matmul weights stored in bf16
        # (halves HBM weight traffic, native MXU path; f32 accumulation in-kernel).
        "ln1_g": jnp.ones((DEPTH, 1, DIM), jnp.float32),
        "w_qkv": w_qkv.astype(jnp.bfloat16),
        "w_o": nrm((DEPTH, DIM, DIM)).astype(jnp.bfloat16),
        "ln2_g": jnp.ones((DEPTH, 1, DIM), jnp.float32),
        "w_ff1": nrm((DEPTH, DIM, FF)).astype(jnp.bfloat16),
        "w_ff2": nrm((DEPTH, FF, DIM)).astype(jnp.bfloat16),
        "final_norm_g": jnp.ones((1, DIM), jnp.float32),
        "proj_out_w": nrm((DIM, DIM)).astype(jnp.bfloat16),
    }
    return params


# ---------------- driver ----------------
if __name__ == "__main__":
    key = jax.random.PRNGKey(0)
    kp, k1, k2, k3 = jax.random.split(key, 4)
    params = init_params(kp)

    B = 2
    mol_embed = jax.random.normal(k1, (B, DIM), jnp.float32)
    morpho_embed = jax.random.normal(k2, (B, DIM), jnp.float32)
    L = 10  # < MAX_MORPHO_LEN to exercise the padding path
    morpho_encodings = jax.random.normal(k3, (B, L, DIM), jnp.float32)
    # zero a couple of trailing positions so the validity mask has False entries
    morpho_encodings = morpho_encodings.at[:, -2:, :].set(0.0)
    timesteps = jnp.array([3.0, 17.0], jnp.float32)

    pred_mol_embed = img2mol_prior_forward(
        params, mol_embed, timesteps,
        morpho_embed=morpho_embed,
        morpho_encodings=morpho_encodings)
    jax.block_until_ready(pred_mol_embed)

    assert pred_mol_embed.shape == (B, DIM), pred_mol_embed.shape
    assert jnp.all(jnp.isfinite(pred_mol_embed))
    print("KERNEL_OK")
</pallas_src>

<mosaic_0001>
module attributes {stable_mosaic.version = 11 : i64} {
  func.func @_prior_kernel(%arg0: i32, %arg1: memref<2x16x128xf32, #tpu.memory_space<vmem>>, %arg2: memref<1x1x128xf32, #tpu.memory_space<vmem>>, %arg3: memref<1x128x384xbf16, #tpu.memory_space<vmem>>, %arg4: memref<1x128x128xbf16, #tpu.memory_space<vmem>>, %arg5: memref<1x1x128xf32, #tpu.memory_space<vmem>>, %arg6: memref<1x128x512xbf16, #tpu.memory_space<vmem>>, %arg7: memref<1x512x128xbf16, #tpu.memory_space<vmem>>, %arg8: memref<1x128xf32, #tpu.memory_space<vmem>>, %arg9: memref<128x128xbf16, #tpu.memory_space<vmem>>, %arg10: memref<2x128xf32, #tpu.memory_space<vmem>>, %arg11: memref<2x16x128xf32, #tpu.memory_space<vmem>>) attributes {dimension_semantics = [#tpu.dimension_semantics<arbitrary>], iteration_bounds = array<i64: 2>, scalar_prefetch = 0 : i64, scratch_operands = 1 : i64, tpu.core_type = #tpu.core_type<tc>, window_params = [{pipeline_mode = #tpu.pipeline_mode<synchronous>, transform_indices = @transform_0, window_bounds = array<i64: 2, 16, 128>}, {transform_indices = @transform_1, window_bounds = array<i64: 1, 1, 128>}, {transform_indices = @transform_2, window_bounds = array<i64: 1, 128, 384>}, {transform_indices = @transform_3, window_bounds = array<i64: 1, 128, 128>}, {transform_indices = @transform_4, window_bounds = array<i64: 1, 1, 128>}, {transform_indices = @transform_5, window_bounds = array<i64: 1, 128, 512>}, {transform_indices = @transform_6, window_bounds = array<i64: 1, 512, 128>}, {pipeline_mode = #tpu.pipeline_mode<synchronous>, transform_indices = @transform_7, window_bounds = array<i64: 1, 128>}, {pipeline_mode = #tpu.pipeline_mode<synchronous>, transform_indices = @transform_8, window_bounds = array<i64: 128, 128>}, {pipeline_mode = #tpu.pipeline_mode<synchronous>, transform_indices = @transform_9, window_bounds = array<i64: 2, 128>}]} {
    %c0_i32 = arith.constant 0 : i32
    %0 = arith.cmpi eq, %arg0, %c0_i32 : i32
    %1 = arith.extui %0 : i1 to i32
    %c0_i32_0 = arith.constant 0 : i32
    %2 = arith.cmpi ne, %1, %c0_i32_0 : i32
    scf.if %2 {
      %c0_48 = arith.constant 0 : index
      %c0_49 = arith.constant 0 : index
      %c0_50 = arith.constant 0 : index
      %148 = vector.load %arg1[%c0_48, %c0_49, %c0_50] : memref<2x16x128xf32, #tpu.memory_space<vmem>>, vector<2x16x128xf32>
      %c0_51 = arith.constant 0 : index
      %c0_52 = arith.constant 0 : index
      %c0_53 = arith.constant 0 : index
      %149 = vector.load %arg11[%c0_51, %c0_52, %c0_53] : memref<2x16x128xf32, #tpu.memory_space<vmem>>, vector<2x16x128xf32>
      tpu.vector_store %arg11[%c0_51, %c0_52, %c0_53], %148 {strides = array<i32>} : memref<2x16x128xf32, #tpu.memory_space<vmem>>, vector<2x16x128xf32>,
    } else {
    }
    %c0 = arith.constant 0 : index
    %c0_1 = arith.constant 0 : index
    %c0_2 = arith.constant 0 : index
    %3 = vector.load %arg11[%c0, %c0_1, %c0_2] : memref<2x16x128xf32, #tpu.memory_space<vmem>>, vector<2x16x128xf32>
    %4 = tpu.iota {dimensions = array<i32: 0>} : vector<16x16xi32>
    %5 = tpu.iota {dimensions = array<i32: 1>} : vector<16x16xi32>
    %6 = arith.cmpi sgt, %5, %4 : vector<16x16xi32>
    %cst = arith.constant -1.000000e+30 : f32
    %cst_3 = arith.constant 0.000000e+00 : f32
    %7 = vector.broadcast %cst : f32 to vector<16x16xf32>
    %8 = vector.broadcast %cst_3 : f32 to vector<16x16xf32>
    %9 = arith.select %6, %7, %8 : vector<16x16xi1>, vector<16x16xf32>
    %c0_4 = arith.constant 0 : index
    %c0_5 = arith.constant 0 : index
    %c0_6 = arith.constant 0 : index
    %10 = vector.load %arg2[%c0_4, %c0_5, %c0_6] : memref<1x1x128xf32, #tpu.memory_space<vmem>>, vector<1x1x128xf32>
    %11 = vector.shape_cast %10 : vector<1x1x128xf32> to vector<1x128xf32>
    %cst_7 = arith.constant dense<0.000000e+00> : vector<2x16xf32>
    %12 = vector.multi_reduction <add>, %3, %cst_7 [2] : vector<2x16x128xf32> to vector<2x16xf32>
    %13 = vector.shape_cast %12 : vector<2x16xf32> to vector<2x16x1xf32>
    %cst_8 = arith.constant 1.280000e+02 : f32
    %14 = vector.broadcast %cst_8 : f32 to vector<2x16x1xf32>
    %15 = arith.divf %13, %14 : vector<2x16x1xf32>
    %16 = vector.broadcast %15 : vector<2x16x1xf32> to vector<2x16x128xf32>
    %17 = arith.subf %3, %16 : vector<2x16x128xf32>
    %18 = arith.mulf %17, %17 : vector<2x16x128xf32>
    %cst_9 = arith.constant dense<0.000000e+00> : vector<2x16xf32>
    %19 = vector.multi_reduction <add>, %18, %cst_9 [2] : vector<2x16x128xf32> to vector<2x16xf32>
    %20 = vector.shape_cast %19 : vector<2x16xf32> to vector<2x16x1xf32>
    %cst_10 = arith.constant 1.280000e+02 : f32
    %21 = vector.broadcast %cst_10 : f32 to vector<2x16x1xf32>
    %22 = arith.divf %20, %21 : vector<2x16x1xf32>
    %23 = vector.broadcast %15 : vector<2x16x1xf32> to vector<2x16x128xf32>
    %24 = arith.subf %3, %23 : vector<2x16x128xf32>
    %cst_11 = arith.constant 9.99999974E-6 : f32
    %25 = vector.broadcast %cst_11 : f32 to vector<2x16x1xf32>
    %26 = arith.addf %22, %25 : vector<2x16x1xf32>
    %27 = math.rsqrt %26 : vector<2x16x1xf32>
    %28 = vector.broadcast %27 : vector<2x16x1xf32> to vector<2x16x128xf32>
    %29 = arith.mulf %24, %28 : vector<2x16x128xf32>
    %30 = vector.shape_cast %11 : vector<1x128xf32> to vector<1x1x128xf32>
    %31 = vector.broadcast %30 : vector<1x1x128xf32> to vector<2x16x128xf32>
    %32 = arith.mulf %29, %31 : vector<2x16x128xf32>
    %33 = vector.shape_cast %32 : vector<2x16x128xf32> to vector<32x128xf32>
    %34 = arith.truncf %33 : vector<32x128xf32> to vector<32x128xbf16>
    %c0_12 = arith.constant 0 : index
    %c0_13 = arith.constant 0 : index
    %c0_14 = arith.constant 0 : index
    %35 = vector.load %arg3[%c0_12, %c0_13, %c0_14] : memref<1x128x384xbf16, #tpu.memory_space<vmem>>, vector<1x128x384xbf16>
    %36 = vector.shape_cast %35 : vector<1x128x384xbf16> to vector<128x384xbf16>
    %cst_15 = arith.constant dense<0.000000e+00> : vector<32x384xf32>
    %37 = tpu.matmul %34, %36, %cst_15 {dimension_numbers = #tpu.dot_dimension_numbers<[1], [0], [0], [1], [0, 0, 1, 1], [], []>} : vector<32x128xbf16>, vector<128x384xbf16>, vector<32x384xf32> -> vector<32x384xf32>
    %38 = vector.extract_strided_slice %37 {offsets = [0, 0], sizes = [32, 128], strides = [1, 1]} : vector<32x384xf32> to vector<32x128xf32>
    %39 = vector.extract_strided_slice %38 {offsets = [0, 0], sizes = [32, 32], strides = [1, 1]} : vector<32x128xf32> to vector<32x32xf32>
    %40 = vector.shape_cast %39 : vector<32x32xf32> to vector<2x16x32xf32>
    %41 = vector.extract_strided_slice %38 {offsets = [0, 32], sizes = [32, 32], strides = [1, 1]} : vector<32x128xf32> to vector<32x32xf32>
    %42 = vector.shape_cast %41 : vector<32x32xf32> to vector<2x16x32xf32>
    %43 = vector.extract_strided_slice %38 {offsets = [0, 64], sizes = [32, 32], strides = [1, 1]} : vector<32x128xf32> to vector<32x32xf32>
    %44 = vector.shape_cast %43 : vector<32x32xf32> to vector<2x16x32xf32>
    %45 = vector.extract_strided_slice %38 {offsets = [0, 96], sizes = [32, 32], strides = [1, 1]} : vector<32x128xf32> to vector<32x32xf32>
    %46 = vector.shape_cast %45 : vector<32x32xf32> to vector<2x16x32xf32>
    %47 = tpu.concatenate %40, %42, %44, %46 in 0 : vector<2x16x32xf32>, vector<2x16x32xf32>, vector<2x16x32xf32>, vector<2x16x32xf32> -> vector<8x16x32xf32>
    %48 = vector.extract_strided_slice %37 {offsets = [0, 128], sizes = [32, 128], strides = [1, 1]} : vector<32x384xf32> to vector<32x128xf32>
    %49 = vector.extract_strided_slice %48 {offsets = [0, 0], sizes = [32, 32], strides = [1, 1]} : vector<32x128xf32> to vector<32x32xf32>
    %50 = vector.shape_cast %49 : vector<32x32xf32> to vector<2x16x32xf32>
    %51 = vector.extract_strided_slice %48 {offsets = [0, 32], sizes = [32, 32], strides = [1, 1]} : vector<32x128xf32> to vector<32x32xf32>
    %52 = vector.shape_cast %51 : vector<32x32xf32> to vector<2x16x32xf32>
    %53 = vector.extract_strided_slice %48 {offsets = [0, 64], sizes = [32, 32], strides = [1, 1]} : vector<32x128xf32> to vector<32x32xf32>
    %54 = vector.shape_cast %53 : vector<32x32xf32> to vector<2x16x32xf32>
    %55 = vector.extract_strided_slice %48 {offsets = [0, 96], sizes = [32, 32], strides = [1, 1]} : vector<32x128xf32> to vector<32x32xf32>
    %56 = vector.shape_cast %55 : vector<32x32xf32> to vector<2x16x32xf32>
    %57 = tpu.concatenate %50, %52, %54, %56 in 0 : vector<2x16x32xf32>, vector<2x16x32xf32>, vector<2x16x32xf32>, vector<2x16x32xf32> -> vector<8x16x32xf32>
    %58 = vector.extract_strided_slice %37 {offsets = [0, 256], sizes = [32, 128], strides = [1, 1]} : vector<32x384xf32> to vector<32x128xf32>
    %59 = vector.extract_strided_slice %58 {offsets = [0, 0], sizes = [32, 32], strides = [1, 1]} : vector<32x128xf32> to vector<32x32xf32>
    %60 = vector.shape_cast %59 : vector<32x32xf32> to vector<2x16x32xf32>
    %61 = vector.extract_strided_slice %58 {offsets = [0, 32], sizes = [32, 32], strides = [1, 1]} : vector<32x128xf32> to vector<32x32xf32>
    %62 = vector.shape_cast %61 : vector<32x32xf32> to vector<2x16x32xf32>
    %63 = vector.extract_strided_slice %58 {offsets = [0, 64], sizes = [32, 32], strides = [1, 1]} : vector<32x128xf32> to vector<32x32xf32>
    %64 = vector.shape_cast %63 : vector<32x32xf32> to vector<2x16x32xf32>
    %65 = vector.extract_strided_slice %58 {offsets = [0, 96], sizes = [32, 32], strides = [1, 1]} : vector<32x128xf32> to vector<32x32xf32>
    %66 = vector.shape_cast %65 : vector<32x32xf32> to vector<2x16x32xf32>
    %67 = tpu.concatenate %60, %62, %64, %66 in 0 : vector<2x16x32xf32>, vector<2x16x32xf32>, vector<2x16x32xf32>, vector<2x16x32xf32> -> vector<8x16x32xf32>
    "tpu.trace_start"() <{level = 10 : i32, message = "nqd,nkd->nqk"}> : () -> ()
    %cst_16 = arith.constant dense<0.000000e+00> : vector<8x16x16xf32>
    %68 = tpu.matmul %47, %57, %cst_16 {dimension_numbers = #tpu.dot_dimension_numbers<[2], [2], [1], [1], [0, 0, 0, 1, 1, 1], [0], [0]>} : vector<8x16x32xf32>, vector<8x16x32xf32>, vector<8x16x16xf32> -> vector<8x16x16xf32>
    "tpu.trace_stop"() : () -> ()
    %69 = vector.shape_cast %9 : vector<16x16xf32> to vector<1x16x16xf32>
    %70 = vector.broadcast %69 : vector<1x16x16xf32> to vector<8x16x16xf32>
    %71 = arith.addf %68, %70 : vector<8x16x16xf32>
    %cst_17 = arith.constant dense<0xFF800000> : vector<8x16xf32>
    %72 = vector.multi_reduction <maximumf>, %71, %cst_17 [2] : vector<8x16x16xf32> to vector<8x16xf32>
    %73 = vector.shape_cast %72 : vector<8x16xf32> to vector<8x16x1xf32>
    %74 = vector.broadcast %73 : vector<8x16x1xf32> to vector<8x16x16xf32>
    %75 = arith.subf %71, %74 : vector<8x16x16xf32>
    %76 = math.exp %75 : vector<8x16x16xf32>
    %cst_18 = arith.constant dense<0.000000e+00> : vector<8x16xf32>
    %77 = vector.multi_reduction <add>, %76, %cst_18 [2] : vector<8x16x16xf32> to vector<8x16xf32>
    %78 = vector.shape_cast %77 : vector<8x16xf32> to vector<8x16x1xf32>
    %79 = vector.broadcast %78 : vector<8x16x1xf32> to vector<8x16x16xf32>
    %80 = arith.divf %76, %79 : vector<8x16x16xf32>
    "tpu.trace_start"() <{level = 10 : i32, message = "nqk,nkd->nqd"}> : () -> ()
    %cst_19 = arith.constant dense<0.000000e+00> : vector<8x16x32xf32>
    %81 = tpu.matmul %80, %67, %cst_19 {dimension_numbers = #tpu.dot_dimension_numbers<[2], [1], [1], [2], [0, 0, 0, 1, 1, 2], [0], [0]>} : vector<8x16x16xf32>, vector<8x16x32xf32>, vector<8x16x32xf32> -> vector<8x16x32xf32>
    "tpu.trace_stop"() : () -> ()
    %82 = vector.extract_strided_slice %81 {offsets = [0, 0, 0], sizes = [2, 16, 32], strides = [1, 1, 1]} : vector<8x16x32xf32> to vector<2x16x32xf32>
    %83 = vector.shape_cast %82 : vector<2x16x32xf32> to vector<32x32xf32>
    %84 = vector.extract_strided_slice %81 {offsets = [2, 0, 0], sizes = [2, 16, 32], strides = [1, 1, 1]} : vector<8x16x32xf32> to vector<2x16x32xf32>
    %85 = vector.shape_cast %84 : vector<2x16x32xf32> to vector<32x32xf32>
    %86 = vector.extract_strided_slice %81 {offsets = [4, 0, 0], sizes = [2, 16, 32], strides = [1, 1, 1]} : vector<8x16x32xf32> to vector<2x16x32xf32>
    %87 = vector.shape_cast %86 : vector<2x16x32xf32> to vector<32x32xf32>
    %88 = vector.extract_strided_slice %81 {offsets = [6, 0, 0], sizes = [2, 16, 32], strides = [1, 1, 1]} : vector<8x16x32xf32> to vector<2x16x32xf32>
    %89 = vector.shape_cast %88 : vector<2x16x32xf32> to vector<32x32xf32>
    %90 = tpu.concatenate %83, %85, %87, %89 in 1 : vector<32x32xf32>, vector<32x32xf32>, vector<32x32xf32>, vector<32x32xf32> -> vector<32x128xf32>
    %91 = arith.truncf %90 : vector<32x128xf32> to vector<32x128xbf16>
    %c0_20 = arith.constant 0 : index
    %c0_21 = arith.constant 0 : index
    %c0_22 = arith.constant 0 : index
    %92 = vector.load %arg4[%c0_20, %c0_21, %c0_22] : memref<1x128x128xbf16, #tpu.memory_space<vmem>>, vector<1x128x128xbf16>
    %93 = vector.shape_cast %92 : vector<1x128x128xbf16> to vector<128x128xbf16>
    %cst_23 = arith.constant dense<0.000000e+00> : vector<32x128xf32>
    %94 = tpu.matmul %91, %93, %cst_23 {dimension_numbers = #tpu.dot_dimension_numbers<[1], [0], [0], [1], [0, 0, 1, 1], [], []>} : vector<32x128xbf16>, vector<128x128xbf16>, vector<32x128xf32> -> vector<32x128xf32>
    %95 = vector.shape_cast %94 : vector<32x128xf32> to vector<2x16x128xf32>
    %96 = arith.addf %3, %95 : vector<2x16x128xf32>
    %c0_24 = arith.constant 0 : index
    %c0_25 = arith.constant 0 : index
    %c0_26 = arith.constant 0 : index
    %97 = vector.load %arg5[%c0_24, %c0_25, %c0_26] : memref<1x1x128xf32, #tpu.memory_space<vmem>>, vector<1x1x128xf32>
    %98 = vector.shape_cast %97 : vector<1x1x128xf32> to vector<1x128xf32>
    %cst_27 = arith.constant dense<0.000000e+00> : vector<2x16xf32>
    %99 = vector.multi_reduction <add>, %96, %cst_27 [2] : vector<2x16x128xf32> to vector<2x16xf32>
    %100 = vector.shape_cast %99 : vector<2x16xf32> to vector<2x16x1xf32>
    %cst_28 = arith.constant 1.280000e+02 : f32
    %101 = vector.broadcast %cst_28 : f32 to vector<2x16x1xf32>
    %102 = arith.divf %100, %101 : vector<2x16x1xf32>
    %103 = vector.broadcast %102 : vector<2x16x1xf32> to vector<2x16x128xf32>
    %104 = arith.subf %96, %103 : vector<2x16x128xf32>
    %105 = arith.mulf %104, %104 : vector<2x16x128xf32>
    %cst_29 = arith.constant dense<0.000000e+00> : vector<2x16xf32>
    %106 = vector.multi_reduction <add>, %105, %cst_29 [2] : vector<2x16x128xf32> to vector<2x16xf32>
    %107 = vector.shape_cast %106 : vector<2x16xf32> to vector<2x16x1xf32>
    %cst_30 = arith.constant 1.280000e+02 : f32
    %108 = vector.broadcast %cst_30 : f32 to vector<2x16x1xf32>
    %109 = arith.divf %107, %108 : vector<2x16x1xf32>
    %110 = vector.broadcast %102 : vector<2x16x1xf32> to vector<2x16x128xf32>
    %111 = arith.subf %96, %110 : vector<2x16x128xf32>
    %cst_31 = arith.constant 9.99999974E-6 : f32
    %112 = vector.broadcast %cst_31 : f32 to vector<2x16x1xf32>
    %113 = arith.addf %109, %112 : vector<2x16x1xf32>
    %114 = math.rsqrt %113 : vector<2x16x1xf32>
    %115 = vector.broadcast %114 : vector<2x16x1xf32> to vector<2x16x128xf32>
    %116 = arith.mulf %111, %115 : vector<2x16x128xf32>
    %117 = vector.shape_cast %98 : vector<1x128xf32> to vector<1x1x128xf32>
    %118 = vector.broadcast %117 : vector<1x1x128xf32> to vector<2x16x128xf32>
    %119 = arith.mulf %116, %118 : vector<2x16x128xf32>
    %120 = vector.shape_cast %119 : vector<2x16x128xf32> to vector<32x128xf32>
    %121 = arith.truncf %120 : vector<32x128xf32> to vector<32x128xbf16>
    %c0_32 = arith.constant 0 : index
    %c0_33 = arith.constant 0 : index
    %c0_34 = arith.constant 0 : index
    %122 = vector.load %arg6[%c0_32, %c0_33, %c0_34] : memref<1x128x512xbf16, #tpu.memory_space<vmem>>, vector<1x128x512xbf16>
    %123 = vector.shape_cast %122 : vector<1x128x512xbf16> to vector<128x512xbf16>
    %cst_35 = arith.constant dense<0.000000e+00> : vector<32x512xf32>
    %124 = tpu.matmul %121, %123, %cst_35 {dimension_numbers = #tpu.dot_dimension_numbers<[1], [0], [0], [1], [0, 0, 1, 1], [], []>} : vector<32x128xbf16>, vector<128x512xbf16>, vector<32x512xf32> -> vector<32x512xf32>
    %125 = arith.mulf %124, %124 : vector<32x512xf32>
    %126 = arith.mulf %124, %125 : vector<32x512xf32>
    %cst_36 = arith.constant 4.471500e-02 : f32
    %127 = vector.broadcast %cst_36 : f32 to vector<32x512xf32>
    %128 = arith.mulf %127, %126 : vector<32x512xf32>
    %129 = arith.addf %124, %128 : vector<32x512xf32>
    %cst_37 = arith.constant 0.797884583 : f32
    %130 = vector.broadcast %cst_37 : f32 to vector<32x512xf32>
    %131 = arith.mulf %130, %129 : vector<32x512xf32>
    %132 = math.tanh %131 : vector<32x512xf32>
    %cst_38 = arith.constant 1.000000e+00 : f32
    %133 = vector.broadcast %cst_38 : f32 to vector<32x512xf32>
    %134 = arith.addf %133, %132 : vector<32x512xf32>
    %cst_39 = arith.constant 5.000000e-01 : f32
    %135 = vector.broadcast %cst_39 : f32 to vector<32x512xf32>
    %136 = arith.mulf %135, %134 : vector<32x512xf32>
    %137 = arith.mulf %124, %136 : vector<32x512xf32>
    %138 = arith.truncf %137 : vector<32x512xf32> to vector<32x512xbf16>
    %c0_40 = arith.constant 0 : index
    %c0_41 = arith.constant 0 : index
    %c0_42 = arith.constant 0 : index
    %139 = vector.load %arg7[%c0_40, %c0_41, %c0_42] : memref<1x512x128xbf16, #tpu.memory_space<vmem>>, vector<1x512x128xbf16>
    %140 = vector.shape_cast %139 : vector<1x512x128xbf16> to vector<512x128xbf16>
    %cst_43 = arith.constant dense<0.000000e+00> : vector<32x128xf32>
    %141 = tpu.matmul %138, %140, %cst_43 {dimension_numbers = #tpu.dot_dimension_numbers<[1], [0], [0], [1], [0, 0, 1, 1], [], []>} : vector<32x512xbf16>, vector<512x128xbf16>, vector<32x128xf32> -> vector<32x128xf32>
    %142 = vector.shape_cast %141 : vector<32x128xf32> to vector<2x16x128xf32>
    %143 = arith.addf %96, %142 : vector<2x16x128xf32>
    %c0_44 = arith.constant 0 : index
    %c0_45 = arith.constant 0 : index
    %c0_46 = arith.constant 0 : index
    %144 = vector.load %arg11[%c0_44, %c0_45, %c0_46] : memref<2x16x128xf32, #tpu.memory_space<vmem>>, vector<2x16x128xf32>
    tpu.vector_store %arg11[%c0_44, %c0_45, %c0_46], %143 {strides = array<i32>} : memref<2x16x128xf32, #tpu.memory_space<vmem>>, vector<2x16x128xf32>,
    %c1_i32 = arith.constant 1 : i32
    %145 = arith.cmpi eq, %arg0, %c1_i32 : i32
    %146 = arith.extui %145 : i1 to i32
    %c0_i32_47 = arith.constant 0 : i32
    %147 = arith.cmpi ne, %146, %c0_i32_47 : i32
    scf.if %147 {
      %148 = vector.extract_strided_slice %143 {offsets = [0, 15, 0], sizes = [2, 1, 128], strides = [1, 1, 1]} : vector<2x16x128xf32> to vector<2x1x128xf32>
      %149 = vector.shape_cast %148 : vector<2x1x128xf32> to vector<2x128xf32>
      %c0_48 = arith.constant 0 : index
      %c0_49 = arith.constant 0 : index
      %150 = vector.load %arg8[%c0_48, %c0_49] : memref<1x128xf32, #tpu.memory_space<vmem>>, vector<1x128xf32>
      %cst_50 = arith.constant dense<0.000000e+00> : vector<2xf32>
      %151 = vector.multi_reduction <add>, %149, %cst_50 [1] : vector<2x128xf32> to vector<2xf32>
      %152 = vector.shape_cast %151 : vector<2xf32> to vector<2x1xf32>
      %cst_51 = arith.constant 1.280000e+02 : f32
      %153 = vector.broadcast %cst_51 : f32 to vector<2x1xf32>
      %154 = arith.divf %152, %153 : vector<2x1xf32>
      %155 = vector.broadcast %154 : vector<2x1xf32> to vector<2x128xf32>
      %156 = arith.subf %149, %155 : vector<2x128xf32>
      %157 = arith.mulf %156, %156 : vector<2x128xf32>
      %cst_52 = arith.constant dense<0.000000e+00> : vector<2xf32>
      %158 = vector.multi_reduction <add>, %157, %cst_52 [1] : vector<2x128xf32> to vector<2xf32>
      %159 = vector.shape_cast %158 : vector<2xf32> to vector<2x1xf32>
      %cst_53 = arith.constant 1.280000e+02 : f32
      %160 = vector.broadcast %cst_53 : f32 to vector<2x1xf32>
      %161 = arith.divf %159, %160 : vector<2x1xf32>
      %162 = vector.broadcast %154 : vector<2x1xf32> to vector<2x128xf32>
      %163 = arith.subf %149, %162 : vector<2x128xf32>
      %cst_54 = arith.constant 9.99999974E-6 : f32
      %164 = vector.broadcast %cst_54 : f32 to vector<2x1xf32>
      %165 = arith.addf %161, %164 : vector<2x1xf32>
      %166 = math.rsqrt %165 : vector<2x1xf32>
      %167 = vector.broadcast %166 : vector<2x1xf32> to vector<2x128xf32>
      %168 = arith.mulf %163, %167 : vector<2x128xf32>
      %169 = vector.broadcast %150 : vector<1x128xf32> to vector<2x128xf32>
      %170 = arith.mulf %168, %169 : vector<2x128xf32>
      %171 = arith.truncf %170 : vector<2x128xf32> to vector<2x128xbf16>
      %c0_55 = arith.constant 0 : index
      %c0_56 = arith.constant 0 : index
      %172 = vector.load %arg9[%c0_55, %c0_56] : memref<128x128xbf16, #tpu.memory_space<vmem>>, vector<128x128xbf16>
      %cst_57 = arith.constant dense<0.000000e+00> : vector<2x128xf32>
      %173 = tpu.matmul %171, %172, %cst_57 {dimension_numbers = #tpu.dot_dimension_numbers<[1], [0], [0], [1], [0, 0, 1, 1], [], []>} : vector<2x128xbf16>, vector<128x128xbf16>, vector<2x128xf32> -> vector<2x128xf32>
      %c0_58 = arith.constant 0 : index
      %c0_59 = arith.constant 0 : index
      %174 = vector.load %arg10[%c0_58, %c0_59] : memref<2x128xf32, #tpu.memory_space<vmem>>, vector<2x128xf32>
      tpu.vector_store %arg10[%c0_58, %c0_59], %173 {strides = array<i32>} : memref<2x128xf32, #tpu.memory_space<vmem>>, vector<2x128xf32>,
    } else {
    }
    return
  }
  func.func @transform_0(%arg0: i32) -> (i32, i32, i32) {
    %c0_i32 = arith.constant 0 : i32
    %c0_i32_0 = arith.constant 0 : i32
    %c0_i32_1 = arith.constant 0 : i32
    %c0_i32_2 = arith.constant 0 : i32
    return %c0_i32, %c0_i32_0, %c0_i32_1 : i32, i32, i32
  }
  func.func @transform_1(%arg0: i32) -> (i32, i32, i32) {
    %c0_i32 = arith.constant 0 : i32
    %c0_i32_0 = arith.constant 0 : i32
    %c0_i32_1 = arith.constant 0 : i32
    return %arg0, %c0_i32, %c0_i32_0 : i32, i32, i32
  }
  func.func @transform_2(%arg0: i32) -> (i32, i32, i32) {
    %c0_i32 = arith.constant 0 : i32
    %c0_i32_0 = arith.constant 0 : i32
    %c0_i32_1 = arith.constant 0 : i32
    return %arg0, %c0_i32, %c0_i32_0 : i32, i32, i32
  }
  func.func @transform_3(%arg0: i32) -> (i32, i32, i32) {
    %c0_i32 = arith.constant 0 : i32
    %c0_i32_0 = arith.constant 0 : i32
    %c0_i32_1 = arith.constant 0 : i32
    return %arg0, %c0_i32, %c0_i32_0 : i32, i32, i32
  }
  func.func @transform_4(%arg0: i32) -> (i32, i32, i32) {
    %c0_i32 = arith.constant 0 : i32
    %c0_i32_0 = arith.constant 0 : i32
    %c0_i32_1 = arith.constant 0 : i32
    return %arg0, %c0_i32, %c0_i32_0 : i32, i32, i32
  }
  func.func @transform_5(%arg0: i32) -> (i32, i32, i32) {
    %c0_i32 = arith.constant 0 : i32
    %c0_i32_0 = arith.constant 0 : i32
    %c0_i32_1 = arith.constant 0 : i32
    return %arg0, %c0_i32, %c0_i32_0 : i32, i32, i32
  }
  func.func @transform_6(%arg0: i32) -> (i32, i32, i32) {
    %c0_i32 = arith.constant 0 : i32
    %c0_i32_0 = arith.constant 0 : i32
    %c0_i32_1 = arith.constant 0 : i32
    return %arg0, %c0_i32, %c0_i32_0 : i32, i32, i32
  }
  func.func @transform_7(%arg0: i32) -> (i32, i32) {
    %c0_i32 = arith.constant 0 : i32
    %c0_i32_0 = arith.constant 0 : i32
    %c0_i32_1 = arith.constant 0 : i32
    return %c0_i32, %c0_i32_0 : i32, i32
  }
  func.func @transform_8(%arg0: i32) -> (i32, i32) {
    %c0_i32 = arith.constant 0 : i32
    %c0_i32_0 = arith.constant 0 : i32
    %c0_i32_1 = arith.constant 0 : i32
    return %c0_i32, %c0_i32_0 : i32, i32
  }
  func.func @transform_9(%arg0: i32) -> (i32, i32) {
    %c0_i32 = arith.constant 0 : i32
    %c0_i32_0 = arith.constant 0 : i32
    %c0_i32_1 = arith.constant 0 : i32
    return %c0_i32, %c0_i32_0 : i32, i32
  }
}

</mosaic_0001>

<bundles_post_ra>
// kernel: tpu_custom_call.1
= control target key start
LH: loop header
LB: loop body
LE: loop exit
PB: predicated region body
PF: predicated region fallthrough
CT: control target
= control target key end

     0   :  { %s6122_s0 = inlined_call_operand.hbm [shape: f32[2,16,128], index: 0, kind: input, shape index: {}]   ;;  %s6123_s1 = inlined_call_operand.vmem [shape: f32[2,1,128], index: 1, kind: input, shape index: {}]   ;;  %s6124_s2 = inlined_call_operand.hbm [shape: bf16[2,128,384], index: 2, kind: input, shape index: {}]   ;;  %s6125_s3 = inlined_call_operand.hbm [shape: bf16[2,128,128], index: 3, kind: input, shape index: {}]   ;;  %s6126_s4 = inlined_call_operand.vmem [shape: f32[2,1,128], index: 4, kind: input, shape index: {}]   ;;  %s6127_s5 = inlined_call_operand.hbm [shape: bf16[2,128,512], index: 5, kind: input, shape index: {}]   ;;  %s6128_s6 = inlined_call_operand.hbm [shape: bf16[2,512,128], index: 6, kind: input, shape index: {}]   ;;  %s6129_s7 = inlined_call_operand.vmem [shape: f32[1,128], index: 7, kind: input, shape index: {}]   ;;  %s6130_s8 = inlined_call_operand.hbm [shape: bf16[128,128], index: 8, kind: input, shape index: {}]   ;;  %s6131_s9 = inlined_call_operand.hbm [shape: f32[2,128], index: 9, kind: output, shape index: {}]  }
   0x1   :  { %6144 = sst [smem:[#allocation23_spill]] %s6124_s2 }
   0x2   :  { %6145 = sst [smem:[#allocation24_spill]] %s6126_s4 }
   0x3   :  { %6146 = sst [smem:[#allocation25_spill]] %s6127_s5 }
   0x4   :  { %6147 = sst [smem:[#allocation26_spill]] %s6129_s7 }
   0x5   :  { %6148 = sst [smem:[#allocation27_spill]] %s6131_s9 }
   0x6   :  { %14 = vsyncpa [#allocation4], 0 }
   0x7   :  { %15 = vsyncpa [#allocation7], 0 }
   0x8   :  { %17 = vsyncpa [#allocation7 + $0x1], 0 }
   0x9   :  { %18 = vsyncpa [#allocation10], 0 }
   0xa   :  { %20 = vsyncpa [#allocation10 + $0x1], 0 }
   0xb   :  { %21 = vsyncpa [#allocation13], 0 }
   0xc   :  { %22 = vsyncpa [#allocation5], 0  ;;  %s5181_s30 = smov 0   ;;  %s5183_s10 = smov 0  }
   0xd   :  { %s5185_s11 = smov 0   ;;  %s5187_s12 = smov 0  }
   0xe LB: > { %6149 = sst [smem:[#allocation20_spill]] %s5103_s11  ;;  %s5202_s13 = sadd.s32 1, %s5107_s12   ;;  %s5107_s12 = sphi %s5187_s12, %s6177_s12   ;;  %s5103_s11 = sphi %s5185_s11, %s6179_s11   ;;  %s5099_s10 = sphi %s5183_s10, %s6181_s10   ;;  %s5095_s30 = sphi %s5181_s30, %s6180_s30  }
   0xf   : > { %6150 = sst [smem:[#allocation21_spill]] %s5202_s13  ;;  %s82_s14 = sadd.s32 1, %s5103_s11 }
  0x10   : > { %s79_s15 = ssub.s32 %s5107_s12, %s5202_s13  ;;  %p89_p0 = scmp.ne.s32.totalorder %s5103_s11, %s5099_s10 }
  0x11   : > { %p80_p1 = scmp.eq.s32.totalorder %s79_s15, 0  ;;  %p90_p2 = scmp.eq.s32.totalorder %s5107_s12, 0 }
  0x12   : > { %p4462_p3 = scmp.lt.s32.totalorder %s5107_s12, 2  ;;  %s6132_s17 = sand.u32 1, %s5107_s12  }
  0x13   : > { %s5212_s16 = scalar_select %p80_p1, %s5103_s11, %s82_s14  }
  0x14   : > { %p91_p4 = por %p90_p2, %p89_p0  ;;  %s5216_s18 = sand.u32 1, %s5103_s11  }
  0x15   : > { %6151 = sst [smem:[#allocation22_spill]] %s5212_s16  ;;  %s4417_s19 = smul.u32 192, %s5216_s18 }
  0x16   : > { %p5219_p5 = pnand %p4462_p3, %p91_p4  ;;  %s4418_s21 = smul.u32 3072, %s5107_s12 }
  0x17   : > { %s6153_s2 = sld [smem:[#allocation23_spill]]  ;;  %s325_s25 = scalar_lea.vmem [#allocation6], %s4417_s19 }
  0x18   : > { %s6152_s20 = scalar_select %p5219_p5, 1, 0 }
  0x19   : > { %s332_s26 = sshll.u32 %s325_s25, 4  ;;  %s5233_s27 = scalar_lea.sflag [#allocation7], %s6132_s17  ;;  %s5229_s26 = int_to_ptr.vmem [resolvable:$true] %s332_s26 }
  0x1a   : > { %p5239_p7 = pneg %p5219_p5 }
  0x1c   : > { %s6154_s29 = scalar_select %p5239_p7, 1, 0 }
  0x1d   : > { %s5227_s24 = scalar_lea.hbm %s6153_s2, %s4418_s21  ;;  %s4860_s19 = scalar_lea.hbm %s6153_s2, 6144 }
  0x1e   : > { %s4855_s28 = scalar_lea.hbm %s5227_s24, 3072  ;;  %p4861_p10 = scmp.lt.u32.totalorder %s5227_s24, %s6153_s2 }
  0x1f   : > { %p4856_p6 = scmp.ne.s32.totalorder %s5227_s24, %s4855_s28  ;;  %p4862_p11 = scmp.lt.u32.totalorder %s4860_s19, %s4855_s28 }
  0x20   : > { %p4864_p13 = scmp.lt.u32.totalorder %s4855_s28, %s5227_s24 }
  0x21   : > { %p4858_p8 = pnand %p5239_p7, %p4856_p6  ;;  %p4863_p12 = por %p4862_p11, %p4861_p10 }
  0x23   : > { %p4859_p9 = pneg %p4858_p8  ;;  %p4865_p0 = por %p4864_p13, %p4863_p12 }
  0x25   : > { %p4866_p1 = pnand %p4865_p0, %p4859_p9 }
  0x27   : > { %4869 = shalt.err (!%p4866_p1)
}
  0x28   : > { %s4870_s23 = scalar_lea.vmem %s5229_s26, 3072  ;;  %s5109_s25 = smov [#allocation6]  }
  0x29   : > { %p4871_p2 = scmp.ne.s32.totalorder %s5229_s26, %s4870_s23  ;;  %s4875_s14 = sshll.u32 %s5109_s25, 4  ;;  %s4876_s14 = int_to_ptr.vmem [resolvable:$false] %s4875_s14 }
  0x2a   : > { %s4877_s15 = scalar_lea.vmem %s4876_s14, 6144  ;;  %p4878_p6 = scmp.lt.s32.totalorder %s5229_s26, %s4876_s14 }
  0x2b   : > { %p4873_p3 = pnand %p4871_p2, %p5239_p7  ;;  %p4879_p8 = scmp.lt.s32.totalorder %s4877_s15, %s4870_s23 }
  0x2d   : > { %p4874_p4 = pneg %p4873_p3  ;;  %p4880_p10 = por %p4879_p8, %p4878_p6 }
  0x2f   : > { %p4881_p11 = pnand %p4880_p10, %p4874_p4 }
  0x31   : > { %4884 = shalt.err (!%p4881_p11)
}
  0x32   : > { %s5110_s28 = smov 192   ;;  %s5111_s19 = smov 12  }
  0x33   : > { %4450 = dma.hbm_to_vmem [thread:$0]  (!%p5219_p5), %s5227_s24, 3072, %s5229_s26, %s5233_s27, %s5110_s28, %s5110_s28, %s5111_s19  }
  0x34   : > { %s3840_s21 = sshll.u32 %s5216_s18, 8  ;;  %s4014_s22 = sshll.u32 %s5107_s12, 12 }
  0x35   : > { %s6155_s5 = sld [smem:[#allocation25_spill]]  ;;  %s373_s15 = scalar_lea.vmem [#allocation9], %s3840_s21 }
  0x36   : > { %s380_s17 = sshll.u32 %s373_s15, 4  ;;  %s6156_s2 = sand.u32 1, %s5107_s12   ;;  %s5274_s17 = int_to_ptr.vmem [resolvable:$true] %s380_s17 }
  0x37   : > { %s5278_s16 = scalar_lea.sflag [#allocation10], %s6156_s2 }
  0x3b   : > { %s5270_s14 = scalar_lea.hbm %s6155_s5, %s4014_s22  ;;  %s4890_s19 = scalar_lea.hbm %s6155_s5, 8192 }
  0x3c   : > { %s4885_s24 = scalar_lea.hbm %s5270_s14, 4096  ;;  %p4891_p0 = scmp.lt.u32.totalorder %s5270_s14, %s6155_s5 }
  0x3d   : > { %p4886_p9 = scmp.ne.s32.totalorder %s5270_s14, %s4885_s24  ;;  %p4892_p1 = scmp.lt.u32.totalorder %s4890_s19, %s4885_s24 }
  0x3e   : > { %p4894_p3 = scmp.lt.u32.totalorder %s4885_s24, %s5270_s14 }
  0x3f   : > { %p4888_p12 = pnand %p4886_p9, %p5239_p7  ;;  %p4893_p2 = por %p4892_p1, %p4891_p0 }
  0x41   : > { %p4889_p13 = pneg %p4888_p12  ;;  %p4895_p4 = por %p4894_p3, %p4893_p2 }
  0x43   : > { %p4896_p6 = pnand %p4895_p4, %p4889_p13 }
  0x45   : > { %4899 = shalt.err (!%p4896_p6)
}
  0x46   : > { %s4900_s2 = scalar_lea.vmem %s5274_s17, 4096  ;;  %s5112_s15 = smov [#allocation9]  }
  0x47   : > { %p4901_p8 = scmp.ne.s32.totalorder %s5274_s17, %s4900_s2  ;;  %s4905_s26 = sshll.u32 %s5112_s15, 4  ;;  %s4906_s26 = int_to_ptr.vmem [resolvable:$false] %s4905_s26 }
  0x48   : > { %s4907_s28 = scalar_lea.vmem %s4906_s26, 8192  ;;  %p4908_p9 = scmp.lt.s32.totalorder %s5274_s17, %s4906_s26 }
  0x49   : > { %p4903_p10 = pnand %p4901_p8, %p5239_p7  ;;  %p4909_p12 = scmp.lt.s32.totalorder %s4907_s28, %s4900_s2 }
  0x4b   : > { %p4904_p11 = pneg %p4903_p10  ;;  %p4910_p0 = por %p4909_p12, %p4908_p9 }
  0x4d   : > { %p4911_p1 = pnand %p4910_p0, %p4904_p11 }
  0x4f   : > { %4914 = shalt.err (!%p4911_p1)
}
  0x50   : > { %s5113_s24 = smov 256   ;;  %s5114_s19 = smov 16  }
  0x51   : > { %4456 = dma.hbm_to_vmem [thread:$0]  (!%p5219_p5), %s5270_s14, 4096, %s5274_s17, %s5278_s16, %s5113_s24, %s5113_s24, %s5114_s19  }
  0x52   : > { %s5307_s2 = scalar_lea.hbm %s6128_s6, %s4014_s22  ;;  %s5311_s15 = scalar_lea.vmem [#allocation11], %s3840_s21 }
  0x53   : > { %s5315_s28 = sadd.s32 4294967295, %s5107_s12   ;;  %p95_p13 = scmp.ne.s32.totalorder %s5099_s10, %s5095_s30 }
  0x54   : > { %p6136_p2 = scmp.eq.s32.totalorder %s5315_s28, 0  ;;  %p3832_p3 = scmp.ge.s32.totalorder %s5107_s12, 1 }
  0x55   : > { %p273_p4 = scmp.lt.s32.totalorder %s5107_s12, 3  ;;  %s5115_s22 = smov [#allocation3]  }
  0x56   : > { %p5324_p6 = por %p6136_p2, %p95_p13  ;;  %s285_s14 = sshll.u32 %s5115_s22, 4  ;;  %s286_s14 = int_to_ptr.vmem [resolvable:$true] %s285_s14 }
  0x57   : > { %p5329_p10 = pnand %p3832_p3, %p273_p4  ;;  %s5116_s24 = smov [#allocation12]  }
  0x58   : > { %s6157_s17 = scalar_select %p5324_p6, 1, 0 }
  0x59   : > { %s6158_s21 = scalar_select %p5329_p10, 1, 0 }
  0x5a   : > { %p4440_p11 = pneg %p5329_p10  ;;  %s301_s19 = sshll.u32 %s5116_s24, 4  ;;  %s5341_s19 = int_to_ptr.vmem [resolvable:$true] %s301_s19 }
  0x5b   : > { %s4915_s26 = scalar_lea.hbm %s6122_s0, 512 }
  0x5c   : > { %p5337_p9 = pnand %p4440_p11, %p6136_p2  ;;  %p4916_p12 = scmp.ne.s32.totalorder %s6122_s0, %s4915_s26 }
  0x5d   : > { %p4922_p3 = scmp.lt.u32.totalorder %s4915_s26, %s6122_s0 }
  0x5e   : > { %p4917_p0 = pneg %p5337_p9 }
  0x60   : > { %p4918_p1 = pnand %p4917_p0, %p4916_p12 }
  0x62   : > { %p4919_p13 = pneg %p4918_p1 }
  0x64   : > { %p4924_p4 = pnand %p4922_p3, %p4919_p13 }
  0x66   : > { %4927 = shalt.err (!%p4924_p4)
}
  0x67   : > { %s4928_s24 = scalar_lea.vmem %s286_s14, 512  ;;  %p4936_p6 = scmp.lt.s32.totalorder %s286_s14, %s286_s14 }
  0x68   : > { %p4929_p11 = scmp.ne.s32.totalorder %s286_s14, %s4928_s24  ;;  %p4937_p10 = scmp.lt.s32.totalorder %s4928_s24, %s4928_s24 }
  0x6a   : > { %p4931_p8 = pnand %p4929_p11, %p4917_p0  ;;  %p4938_p5 = por %p4937_p10, %p4936_p6 }
  0x6c   : > { %p4932_p2 = pneg %p4931_p8 }
  0x6e   : > { %p4939_p7 = pnand %p4938_p5, %p4932_p2 }
  0x70   : > { %4942 = shalt.err (!%p4939_p7)
}
  0x71   : > { %s5117_s5 = smov 128   ;;  %s5118_s23 = smov 8  }
  0x72   : > { %4443 = dma.hbm_to_vmem [thread:$0]  (!%p5337_p9), %s6122_s0, 512, %s286_s14, [#allocation4], %s5117_s5, %s5117_s5, %s5118_s23  }
  0x73   : > { %s4943_s22 = scalar_lea.hbm %s6130_s8, 1024 }
  0x74   : > { %p4944_p8 = scmp.ne.s32.totalorder %s6130_s8, %s4943_s22  ;;  %p4950_p2 = scmp.lt.u32.totalorder %s4943_s22, %s6130_s8 }
  0x76   : > { %p4946_p5 = pnand %p4944_p8, %p4917_p0 }
  0x78   : > { %p4947_p7 = pneg %p4946_p5 }
  0x7a   : > { %p4952_p6 = pnand %p4950_p2, %p4947_p7 }
  0x7c   : > { %4955 = shalt.err (!%p4952_p6)
}
  0x7d   : > { %s4956_s14 = scalar_lea.vmem %s5341_s19, 1024  ;;  %p4964_p13 = scmp.lt.s32.totalorder %s5341_s19, %s5341_s19 }
  0x7e   : > { %p4957_p10 = scmp.ne.s32.totalorder %s5341_s19, %s4956_s14  ;;  %p4965_p3 = scmp.lt.s32.totalorder %s4956_s14, %s4956_s14 }
  0x80   : > { %p4959_p12 = pnand %p4957_p10, %p4917_p0  ;;  %p4966_p4 = por %p4965_p3, %p4964_p13 }
  0x82   : > { %p4960_p1 = pneg %p4959_p12 }
  0x84   : > { %p4967_p11 = pnand %p4966_p4, %p4960_p1 }
  0x86   : > { %4970 = shalt.err (!%p4967_p11)
}
  0x87   : > { %s5119_s4 = smov 64   ;;  %s5120_s7 = smov 4  }
  0x88   : > { %4446 = dma.hbm_to_vmem [thread:$0]  (!%p5337_p9), %s6130_s8, 1024, %s5341_s19, [#allocation13], %s5119_s4, %s5119_s4, %s5120_s7  }
  0x89   : > { %s3837_s23 = sshll.u32 %s5216_s18, 6  ;;  %s4013_s11 = sshll.u32 %s5107_s12, 10 }
  0x8a   : > { %s5398_s25 = scalar_lea.hbm %s6125_s3, %s4013_s11  ;;  %s6160_s22 = sshll.u32 %s5311_s15, 4  ;;  %s5402_s22 = int_to_ptr.vmem [resolvable:$true] %s6160_s22 }
  0x8b   : > { %s346_s30 = scalar_lea.vmem [#allocation8], %s3837_s23  ;;  %s4971_s14 = scalar_lea.hbm %s5398_s25, 1024 }
  0x8c   : > { %s353_s24 = sshll.u32 %s346_s30, 4  ;;  %p4972_p9 = scmp.ne.s32.totalorder %s5398_s25, %s4971_s14  ;;  %s5404_s24 = int_to_ptr.vmem [resolvable:$true] %s353_s24 }
  0x8d   : > { %p6161_p0 = scmp.ne.s32.totalorder %s6154_s29, 0  ;;  %s4976_s19 = scalar_lea.hbm %s6125_s3, 2048 }
  0x8e   : > { %p4977_p7 = scmp.lt.u32.totalorder %s5398_s25, %s6125_s3  ;;  %p4978_p2 = scmp.lt.u32.totalorder %s4976_s19, %s4971_s14 }
  0x8f   : > { %p4974_p8 = pnand %p4972_p9, %p6161_p0  ;;  %p4980_p10 = scmp.lt.u32.totalorder %s4971_s14, %s5398_s25 }
  0x90   : > { %p4979_p6 = por %p4978_p2, %p4977_p7 }
  0x91   : > { %p4975_p5 = pneg %p4974_p8 }
  0x92   : > { %p4981_p12 = por %p4980_p10, %p4979_p6 }
  0x94   : > { %p4982_p1 = pnand %p4981_p12, %p4975_p5 }
  0x96   : > { %4985 = shalt.err (!%p4982_p1)
}
  0x97   : > { %s4986_s5 = scalar_lea.vmem %s5404_s24, 1024  ;;  %s5121_s23 = smov [#allocation8]  }
  0x98   : > { %p4987_p13 = scmp.ne.s32.totalorder %s5404_s24, %s4986_s5  ;;  %s4991_s11 = sshll.u32 %s5121_s23, 4  ;;  %s4992_s11 = int_to_ptr.vmem [resolvable:$false] %s4991_s11 }
  0x99   : > { %s4993_s13 = scalar_lea.vmem %s4992_s11, 2048  ;;  %p4994_p11 = scmp.lt.s32.totalorder %s5404_s24, %s4992_s11 }
  0x9a   : > { %p4989_p3 = pnand %p4987_p13, %p6161_p0  ;;  %p4995_p9 = scmp.lt.s32.totalorder %s4993_s13, %s4986_s5 }
  0x9c   : > { %p4990_p4 = pneg %p4989_p3  ;;  %p4996_p8 = por %p4995_p9, %p4994_p11 }
  0x9e   : > { %p4997_p7 = pnand %p4996_p8, %p4990_p4 }
  0xa0   : > { %5000 = shalt.err (!%p4997_p7)
}
  0xa1   : > { %p6162_p5 = scmp.ne.s32.totalorder %s6152_s20, 0  ;;  %s5001_s26 = scalar_lea.hbm %s5307_s2, 4096 }
  0xa2   : > { %p5002_p2 = scmp.ne.s32.totalorder %s5307_s2, %s5001_s26  ;;  %s5006_s12 = scalar_lea.hbm %s6128_s6, 8192 }
  0xa3   : > { %4453 = dma.hbm_to_vmem [thread:$0]  (!%p6162_p5), %s5398_s25, 1024, %s5404_s24, %s5233_s27, %s5119_s4, %s5119_s4, %s5120_s7  }
  0xa4   : > { %p5004_p6 = pnand %p5002_p2, %p6161_p0  ;;  %p5007_p12 = scmp.lt.u32.totalorder %s5307_s2, %s6128_s6 }
  0xa5   : > { %p5008_p1 = scmp.lt.u32.totalorder %s5006_s12, %s5001_s26  ;;  %p5010_p3 = scmp.lt.u32.totalorder %s5001_s26, %s5307_s2 }
  0xa6   : > { %p5005_p10 = pneg %p5004_p6 }
  0xa7   : > { %p5009_p13 = por %p5008_p1, %p5007_p12 }
  0xa9   : > { %p5011_p4 = por %p5010_p3, %p5009_p13 }
  0xab   : > { %p5012_p11 = pnand %p5011_p4, %p5005_p10 }
  0xad   : > { %5015 = shalt.err (!%p5012_p11)
}
  0xae   : > { %s5016_s27 = scalar_lea.vmem %s5402_s22, 4096  ;;  %s5122_s25 = smov [#allocation11]  }
  0xaf   : > { %p5017_p9 = scmp.ne.s32.totalorder %s5402_s22, %s5016_s27  ;;  %s5021_s24 = sshll.u32 %s5122_s25, 4  ;;  %s5022_s24 = int_to_ptr.vmem [resolvable:$false] %s5021_s24 }
  0xb0   : > { %s5023_s15 = scalar_lea.vmem %s5022_s24, 8192  ;;  %p5024_p2 = scmp.lt.s32.totalorder %s5402_s22, %s5022_s24 }
  0xb1   : > { %p5019_p8 = pnand %p5017_p9, %p6161_p0  ;;  %p5025_p6 = scmp.lt.s32.totalorder %s5023_s15, %s5016_s27 }
  0xb3   : > { %p5020_p7 = pneg %p5019_p8  ;;  %p5026_p12 = por %p5025_p6, %p5024_p2 }
  0xb5   : > { %p5027_p1 = pnand %p5026_p12, %p5020_p7 }
  0xb7   : > { %5030 = shalt.err (!%p5027_p1)
}
  0xb8   : > { %4459 = dma.hbm_to_vmem [thread:$0]  (!%p6162_p5), %s5307_s2, 4096, %s5402_s22, %s5278_s16, %s5119_s4, %s5119_s4, %s5120_s7  }
  0xb9   : > { %p6163_p0 = scmp.ne.s32.totalorder %s6158_s21, 0 }
  0xba   : > { %p6164_p10 = scmp.eq.s32.totalorder (!%p6163_p0), %s5315_s28, 0 }
  0xbb   : > { %413 = sbr.rel (%p6163_p0) target bundleno = 3362 (0xd22), region = 56 }
  0xc2   : > { %5074 = dma.done.wait (%p6164_p10), [#allocation4], 512   ;;  %p6165_p13 = pmov %p6164_p10 }
  0xc3   : > { %s419_s20 = sand.u32 1, %s5315_s28   ;;  %s421_s29 = sand.u32 1, %s5099_s10  }
  0xc4   : > { %5076 = vsyncadd (%p6165_p13), [#allocation4], 4294966784  ;;  %s4419_s9 = smul.u32 192, %s421_s29  ;;  %s420_s5 = scalar_lea.sflag [#allocation7], %s419_s20 }
  0xc5   : > { %p6166_p3 = scmp.ne.s32.totalorder %s6157_s17, 0 }
  0xc6   : > { %s5464_s23 = scalar_lea.vmem [#allocation6], %s4419_s9 }
  0xc7   : > { %5078 = dma.done.wait (%p6166_p3), %s420_s5, 4096  }
  0xc8   : > { %5080 = vsyncadd (%p6166_p3), %s420_s5, 4294963200  ;;  %s3848_s16 = sshll.u32 %s421_s29, 6  ;;  %s3849_s2 = sshll.u32 %s421_s29, 8 }
  0xc9   : > { %s5470_s21 = scalar_lea.vmem [#allocation8], %s3848_s16  ;;  %s438_s4 = scalar_lea.sflag [#allocation10], %s419_s20 }
  0xca   : > { %s5472_s7 = scalar_lea.vmem [#allocation9], %s3849_s2 }
  0xcb   : > { %5082 = dma.done.wait (%p6166_p3), %s438_s4, 8192  }
  0xcc   : > { %5084 = vsyncadd (%p6166_p3), %s438_s4, 4294959104  ;;  %s5478_s22 = scalar_lea.vmem [#allocation11], %s3849_s2  ;;  %p6167_p5 = pmov %p6164_p10 }
  0xce   : > { %5086 = dma.done.wait (%p6167_p5), [#allocation13], 1024   ;;  %p6168_p4 = pmov %p6167_p5 }
  0xcf   : > { %p505_p11 = scmp.lt.s32.totalorder %s5315_s28, 1  ;;  %s6169_s12 = sld [smem:[#allocation24_spill]] }
  0xd0   : > { %5088 = vsyncadd (%p6168_p4), [#allocation13], 4294966272  ;;  %p6170_p9 = scmp.ne.s32.totalorder %s5315_s28, 0 }
  0xd1   : > { %s5486_s11 = scalar_select %p505_p11, %s5315_s28, 1 }
  0xd2   : > { %515 = sbr.rel (%p6170_p9) target bundleno = 217 (0xd9), region = 84  ;;  %v516_v0 = vld [vmem:[#allocation3] sm:$0xff] (!%p6170_p9)  ;;  %v517_v1 = vld [vmem:[#allocation3 + $0x8] sm:$0xff] (!%p6170_p9)  ;;  %v518_v2 = vld [vmem:[#allocation3 + $0x10] sm:$0xff] (!%p6170_p9) }
  0xd3   : > { %s507_s17 = scalar_lea.vmem %s6123_s1, %s5486_s11  ;;  %520 = vst [vmem:[#allocation2] sm:$0xff] (!%p6170_p9), %v516_v0  ;;  %521 = vst [vmem:[#allocation2 + $0x8] sm:$0xff] (!%p6170_p9), %v517_v1  ;;  %v519_v3 = vld [vmem:[#allocation3 + $0x18] sm:$0xff] (!%p6170_p9) }
  0xd4   : > { %522 = vst [vmem:[#allocation2 + $0x10] sm:$0xff] (!%p6170_p9), %v518_v2  ;;  %523 = vst [vmem:[#allocation2 + $0x18] sm:$0xff] (!%p6170_p9), %v519_v3 }
  0xd5   : > { %s510_s18 = scalar_lea.vmem %s6169_s12, %s5486_s11 }
  0xd9 PF: > { %v4607_v8 = vld [vmem:[%s5464_s23 + $0x4] ss:$12 sps:$4 sm:$0xff]   ;;  %v4609_v9 = vld [vmem:[%s5464_s23] ss:$12 sps:$4 sm:$0xff]   ;;  %v4610_v10 = vld [vmem:[%s5464_s23 + $0x1c] ss:$12 sps:$4 sm:$0xff]  }
  0xda   : > { %v524_v4 = vld [vmem:[#allocation2] sm:$0xff]  ;;  %v525_v6 = vld [vmem:[#allocation2 + $0x8] sm:$0xff]  ;;  %755 = vmatprep.subr.bf16.mxu0 %v4607_v8  ;;  %v4617_v31 = vld [vmem:[%s5464_s23 + $0x30] ss:$12 sps:$4 sm:$0xff]   ;;  %v5123_v46 = vmov 0   ;;  %vm953_vm0 = vcmask 261120  }
  0xdb   : > { %v526_v5 = vld [vmem:[#allocation2 + $0x10] sm:$0xff]  ;;  %538 = vadd.xlane.f32.xlu0 %v524_v4  ;;  %v527_v7 = vld [vmem:[#allocation2 + $0x18] sm:$0xff]  ;;  %756 = vmatpush1.bf16.msra.mxu0 %v4609_v9  ;;  %v4616_v30 = vld [vmem:[%s5464_s23 + $0x20] ss:$12 sps:$4 sm:$0xff]   ;;  %s5124_s25 = smov 96   ;;  %s5125_s24 = smov 64  }
  0xdc   : > { %542 = vadd.xlane.f32.xlu1 %v526_v5  ;;  %v4612_v11 = vld [vmem:[%s5464_s23 + $0x8] ss:$12 sps:$4 sm:$0xff]   ;;  %v4613_v12 = vld [vmem:[%s5464_s23 + $0x18] ss:$12 sps:$4 sm:$0xff]   ;;  %757 = vmatprep.subr.bf16.mxu0 %v4610_v10  ;;  %v4624_v36 = vld [vmem:[%s5464_s23 + $0x50] ss:$12 sps:$4 sm:$0xff]  }
  0xdd   : > { %4165 = vmatprep.subr.bf16.mxu1 %v4612_v11  ;;  %v4614_v29 = vld [vmem:[%s5464_s23 + $0x34] ss:$12 sps:$4 sm:$0xff]   ;;  %v4618_v32 = vld [vmem:[%s5464_s23 + $0x4c] ss:$12 sps:$4 sm:$0xff]   ;;  %v4622_v35 = vld [vmem:[%s5464_s23 + $0x64] ss:$12 sps:$4 sm:$0xff]   ;;  %787 = vmatprep.mubr.bf16.mxu0 %v5123_v46 }
  0xde   : > { %4166 = vmatpush3.bf16.msra.mxu1 %v4612_v11  ;;  %v4620_v33 = vld [vmem:[%s5464_s23 + $0x38] ss:$12 sps:$4 sm:$0xff]   ;;  %v4621_v34 = vld [vmem:[%s5464_s23 + $0x48] ss:$12 sps:$4 sm:$0xff]   ;;  %v4625_v37 = vld [vmem:[%s5464_s23 + $0x60] ss:$12 sps:$4 sm:$0xff]  }
  0xdf   : > { %540 = vadd.xlane.f32.xlu0 %v525_v6  ;;  %758 = vmatpush1.bf16.msra.mxu0 %v4613_v12  ;;  %v4626_v38 = vld [vmem:[%s5464_s23 + $0x7c] ss:$12 sps:$4 sm:$0xff]   ;;  %v4629_v40 = vld [vmem:[%s5464_s23 + $0x78] ss:$12 sps:$4 sm:$0xff]   ;;  %v4630_v41 = vld [vmem:[%s5464_s23 + $0x94] ss:$12 sps:$4 sm:$0xff]  }
  0xe0   : > { %544 = vadd.xlane.f32.xlu1 %v527_v7  ;;  %759 = vmatprep.subr.bf16.mxu0 %v4614_v29  ;;  %v4628_v39 = vld [vmem:[%s5464_s23 + $0x68] ss:$12 sps:$4 sm:$0xff]   ;;  %v4632_v42 = vld [vmem:[%s5464_s23 + $0x80] ss:$12 sps:$4 sm:$0xff]   ;;  %v4633_v43 = vld [vmem:[%s5464_s23 + $0x90] ss:$12 sps:$4 sm:$0xff]  }
  0xe1   : > { %4167 = vmatprep.subr.bf16.mxu1 %v4616_v30  ;;  %v4634_v44 = vld [vmem:[%s5464_s23 + $0xac] ss:$12 sps:$4 sm:$0xff]   ;;  %v4637_v47 = vld [vmem:[%s5464_s23 + $0xa8] ss:$12 sps:$4 sm:$0xff]   ;;  %v4638_v48 = vld [vmem:[%s5464_s23 + $0xb0] ss:$12 sps:$4 sm:$0xff]  }
  0xe2   : > { %4168 = vmatpush3.bf16.msra.mxu1 %v4616_v30  ;;  %v4636_v45 = vld [vmem:[%s5464_s23 + $0x98] ss:$12 sps:$4 sm:$0xff]   ;;  %v3853_v0 = vld [vmem:[%s507_s17] ss:$0 sm:$0xff]  ;;  %vm5553_vm1 = vmpackc.low %vm953_vm0, %vm953_vm0  ;;  %s5126_s15 = smov 32   ;;  %vm1618_vm4 = vcmask 130048  }
  0xe3   : > { %760 = vmatpush1.bf16.msra.mxu0 %v4617_v31  ;;  %4169 = vmatprep.subr.bf16.mxu1 %v4620_v33  ;;  %vm2495_vm5 = vcmask 523264   ;;  %vm2500_vm6 = vcmask 785408   ;;  %p3999_p8 = scmp.ne.s32.totalorder %s5315_s28, 1 }
  0xe4   : > { %761 = vmatprep.subr.bf16.mxu0 %v4618_v32  ;;  %vm3507_vm7 = vcmask (!%p3999_p8), 1040384   ;;  %vm3503_vm8 = vcmask (!%p3999_p8), 1047559   ;;  %vm5129_vm9 = vmmov (!%p3999_p8), 0   ;;  %s6174_s16 = sld [smem:[#allocation26_spill]] (!%p3999_p8)  ;;  %vm3578_vm10 = vcmask (!%p3999_p8), 1041409  }
  0xe6   : > { %4170 = vmatpush3.bf16.msra.mxu1 %v4620_v33 }
  0xe7   : > { %762 = vmatpush1.bf16.msra.mxu0 %v4621_v34  ;;  %4171 = vmatprep.subr.bf16.mxu1 %v4624_v36 }
  0xe8   : > { %763 = vmatprep.subr.bf16.mxu0 %v4622_v35 }
  0xea   : > { %4172 = vmatpush3.bf16.msra.mxu1 %v4624_v36 }
  0xeb   : > { %764 = vmatpush1.bf16.msra.mxu0 %v4625_v37  ;;  %4173 = vmatprep.subr.bf16.mxu1 %v4628_v39 }
  0xec   : > { %765 = vmatprep.subr.bf16.mxu0 %v4626_v38 }
  0xee   : > { %4174 = vmatpush3.bf16.msra.mxu1 %v4628_v39 }
  0xef   : > { %766 = vmatpush1.bf16.msra.mxu0 %v4629_v40  ;;  %4175 = vmatprep.subr.bf16.mxu1 %v4632_v42 }
  0xf0   : > { %767 = vmatprep.subr.bf16.mxu0 %v4630_v41 }
  0xf2   : > { %4176 = vmatpush3.bf16.msra.mxu1 %v4632_v42 }
  0xf3   : > { %768 = vmatpush1.bf16.msra.mxu0 %v4633_v43  ;;  %4177 = vmatprep.subr.bf16.mxu1 %v4636_v45 }
  0xf4   : > { %769 = vmatprep.subr.bf16.mxu0 %v4634_v44 }
  0xf6   : > { %4178 = vmatpush3.bf16.msra.mxu1 %v4636_v45 }
  0xf7   : > { %770 = vmatpush1.bf16.msra.mxu0 %v4637_v47  ;;  %4179 = vmatprep.subr.bf16.mxu1 %v4638_v48 }
  0xfa   : > { %4180 = vmatpush3.bf16.msra.mxu1 %v4638_v48 }
 0x168   : > { %v539_v13 = vpop.xlane.xlu0 %538 }
 0x169   : > { %v543_v14 = vpop.xlane.xlu1 %542  ;;  %v547_v15 = vmul.f32 0.0078125, %v539_v13 }
 0x16a   : > { %v549_v16 = vmul.f32 0.0078125, %v543_v14 }
 0x16b   : > { %v5503_v17 = vsub.f32 %v524_v4, %v547_v15 }
 0x16c   : > { %v5505_v18 = vsub.f32 %v526_v5, %v549_v16  ;;  %v541_v19 = vpop.xlane.xlu0 %540 }
 0x16d   : > { %v545_v20 = vpop.xlane.xlu1 %544  ;;  %v548_v21 = vmul.f32 0.0078125, %v541_v19  ;;  %v555_v22 = vmul.f32 %v5503_v17, %v5503_v17 }
 0x16e   : > { %v550_v23 = vmul.f32 0.0078125, %v545_v20  ;;  %v557_v26 = vmul.f32 %v5505_v18, %v5505_v18 }
 0x16f   : > { %v5509_v24 = vsub.f32 %v525_v6, %v548_v21  ;;  %559 = vadd.xlane.f32.xlu0 %v555_v22 }
 0x170   : > { %v5511_v25 = vsub.f32 %v527_v7, %v550_v23 }
 0x171   : > { %v556_v27 = vmul.f32 %v5509_v24, %v5509_v24 }
 0x172   : > { %v558_v28 = vmul.f32 %v5511_v25, %v5511_v25 }
 0x173   : > { %563 = vadd.xlane.f32.xlu0 %v557_v26  ;;  %561 = vadd.xlane.f32.xlu1 %v556_v27 }
 0x177   : > { %565 = vadd.xlane.f32.xlu1 %v558_v28 }
 0x1fc   : > { %v560_v49 = vpop.xlane.xlu0 %559 }
 0x1fd   : > { %v567_v50 = vmul.f32 0.0078125, %v560_v49 }
 0x1ff   : > { %v571_v51 = vadd.f32 1e-05, %v567_v50 }
 0x200   : > { %v562_v52 = vpop.xlane.xlu1 %561  ;;  %v564_v53 = vpop.xlane.xlu0 %563 }
 0x201   : > { %4727 = vrsqrt.f32 %v571_v51  ;;  %v568_v54 = vmul.f32 0.0078125, %v562_v52  ;;  %v569_v55 = vmul.f32 0.0078125, %v564_v53 }
 0x203   : > { %v572_v56 = vadd.f32 1e-05, %v568_v54  ;;  %v573_v57 = vadd.f32 1e-05, %v569_v55 }
 0x204   : > { %v566_v58 = vpop.xlane.xlu1 %565 }
 0x205   : > { %4729 = vrsqrt.f32 %v572_v56  ;;  %v570_v59 = vmul.f32 0.0078125, %v566_v58 }
 0x206   : > { %4731 = vrsqrt.f32 %v573_v57 }
 0x207   : > { %v574_v60 = vadd.f32 1e-05, %v570_v59 }
 0x209   : > { %4733 = vrsqrt.f32 %v574_v60 }
 0x20b   : > { %v4728_v61 = vpop.eup %4727 }
 0x20c   : > { %v579_v62 = vmul.f32 %v4728_v61, %v5503_v17 }
 0x20e   : > { %v589_v3 = vmul.f32 %v3853_v0, %v579_v62 }
 0x20f   : > { %v4730_v63 = vpop.eup %4729 }
 0x210   : > { %v4732_v1 = vpop.eup %4731  ;;  %v580_v2 = vmul.f32 %v4730_v63, %v5509_v24 }
 0x211   : > { %v581_v5 = vmul.f32 %v4732_v1, %v5505_v18 }
 0x212   : > { %v590_v4 = vmul.f32 %v3853_v0, %v580_v2 }
 0x213   : > { %v4734_v6 = vpop.eup %4733  ;;  %v591_v9 = vmul.f32 %v3853_v0, %v581_v5 }
 0x214   : > { %v593_v7 = vpack.c.bf16 %v590_v4, %v589_v3  ;;  %v582_v8 = vmul.f32 %v4734_v6, %v5511_v25  ;;  %v528_v6 = vlaneseq }
 0x216   : > { %788 = vmatmul.mubr.bf16.vlgmr.msra.gmra.mrb[0].mxu0 %v593_v7  ;;  %4181 = vmatprep.mubr.bf16.mxu1 %v593_v7  ;;  %v592_v10 = vmul.f32 %v3853_v0, %v582_v8  ;;  %v529_v7 = vshrl.u32 %v528_v6, 7 }
 0x217   : > { %797 = vmatprep.mubr.bf16.mxu0 %v5123_v46 }
 0x218   : > { %v594_v11 = vpack.c.bf16 %v592_v10, %v591_v9  ;;  %v530_v8 = vadd.s32 8, %v529_v7  ;;  %v532_v9 = vand.u32 127, %v528_v6  ;;  %v5127_v10 = vmov 0.0  }
 0x21a   : > { %4182 = vmatmul.mubr.bf16.vlgmr.msra.gmra.mrb[0].mxu1 %v594_v11  ;;  %vm534_vm2 = vcmp.gt.s32.totalorder %v532_v9, %v530_v8  ;;  %vm533_vm3 = vcmp.gt.s32.totalorder %v532_v9, %v529_v7 }
 0x21e   : > { %798 = vmatmul.mubr.bf16.gmra.mrb[4].mxu0 %v594_v11  ;;  %v536_v11 = vsel %vm534_vm2, -1e+30, %v5127_v10 }
 0x2e9   : > { %v789_v12 = vpop.f32.mrb[0].mxu0 }
 0x2ea   : > { %861 = vrot.lane.b32.xlu1 %v789_v12, %s5124_s25  ;;  %v791_v13 = vpop.f32.mrb[1].mxu0  ;;  %4189 = vmatprep.mubr.msk.f32.mxu1 %vm953_vm0, %v789_v12 }
 0x2eb   : > { %v793_v14 = vpop.f32.mrb[2].mxu0 }
 0x2ec   : > { %v795_v15 = vpop.f32.mrb[3].mxu0 }
 0x2ed   : > { %v4337_v17 = vpack.c.bf16 %v795_v15, %v791_v13  ;;  %v4183_v18 = vpop.f32.mrb[0].mxu1  ;;  %v4517_v19 = vpack.i.bf16 %v795_v15, %v791_v13 }
 0x2ee   : > { %863 = vrot.lane.b32.xlu1 %v793_v14, %s5124_s25  ;;  %v842_v20 = vpop.f32.mrb[1].mxu1 }
 0x2ef   : > { %4518 = vrot.lane.b32.xlu0 %v4517_v19, %s5124_s25  ;;  %v4184_v21 = vpop.f32.mrb[2].mxu1  ;;  %4339 = vmatprep.subr.msk.bf16.mxu1 %vm5553_vm1, %v4337_v17 }
 0x2f0   : > { %v845_v22 = vpop.f32.mrb[3].mxu1  ;;  %4342 = vmatpush3.bf16.xpose.msk.msra.mxu1 %vm5553_vm1, %v4337_v17  ;;  %v5563_v23 = vpack.c.bf16 %v4184_v21, %v4183_v18  ;;  %v5565_v24 = vpack.i.bf16 %v4184_v21, %v4183_v18 }
 0x2f1   : > { %v799_v25 = vpop.f32.mrb[4].mxu0  ;;  %v5567_v26 = vpack.c.bf16 %v845_v22, %v842_v20  ;;  %v5569_v27 = vpack.i.bf16 %v845_v22, %v842_v20 }
 0x2f2   : > { %v801_v28 = vpop.f32.mrb[5].mxu0 }
 0x2f3   : > { %4523 = vrot.lane.b32.xlu0 %v4517_v19, %s5125_s24  ;;  %v803_v29 = vpop.f32.mrb[6].mxu0 }
 0x2f4   : > { %v805_v30 = vpop.f32.mrb[7].mxu0 }
 0x2f5   : > { %v4343_v31 = vpack.c.bf16 %v805_v30, %v801_v28  ;;  %v4527_v32 = vpack.i.bf16 %v805_v30, %v801_v28 }
 0x2f7   : > { %4190 = vmatmul.mubr.msk.f32.vlgmr.msra.gmra.mrb[4].mxu1 %vm953_vm0, %v793_v14  ;;  %865 = vrot.lane.b32.xlu0 %v799_v25, %s5124_s25 }
 0x2f8   : > { %4528 = vrot.lane.b32.xlu1 %v4527_v32, %s5124_s25  ;;  %4345 = vmatprep.subr.msk.bf16.mxu1 %vm5553_vm1, %v4343_v31 }
 0x2f9   : > { %4348 = vmatpush3.bf16.xpose.msk.msra.mxu1 %vm5553_vm1, %v4343_v31  ;;  %4196 = vmatprep.mubr.msk.f32.mxu1 %vm953_vm0, %v799_v25 }
 0x2fb   : > { %4533 = vrot.lane.b32.xlu0 %v4517_v19, %s5126_s15 }
 0x2fc   : > { %867 = vrot.lane.b32.xlu1 %v803_v29, %s5124_s25 }
 0x2ff   : > { %869 = vrot.lane.b32.xlu0 %v789_v12, %s5125_s24 }
 0x300   : > { %4538 = vrot.lane.b32.xlu1 %v4527_v32, %s5125_s24  ;;  %4197 = vmatmul.mubr.msk.f32.vlgmr.msra.gmra.mrb[6].mxu1 %vm953_vm0, %v803_v29 }
 0x303   : > { %873 = vrot.lane.b32.xlu0 %v799_v25, %s5125_s24 }
 0x304   : > { %871 = vrot.lane.b32.xlu1 %v793_v14, %s5125_s24 }
 0x307   : > { %877 = vrot.lane.b32.xlu0 %v789_v12, %s5126_s15  ;;  %v535_v12 = vsel %vm533_vm3, -1e+30, %v5127_v10 }
 0x308   : > { %4543 = vrot.lane.b32.xlu1 %v4527_v32, %s5126_s15 }
 0x30b   : > { %881 = vrot.lane.b32.xlu0 %v799_v25, %s5126_s15 }
 0x30c   : > { %875 = vrot.lane.b32.xlu1 %v803_v29, %s5125_s24 }
 0x310   : > { %879 = vrot.lane.b32.xlu1 %v793_v14, %s5126_s15 }
 0x314   : > { %883 = vrot.lane.b32.xlu1 %v803_v29, %s5126_s15 }
 0x35c   : > { %v862_v33 = vpop.permute.xlu1 %861 }
 0x35d   : > { %4203 = vmatprep.mubr.msk.f32.mxu1 %vm953_vm0, %v862_v33 }
 0x360   : > { %v864_v39 = vpop.permute.xlu1 %863 }
 0x361   : > { %v4519_v34 = vpop.permute.xlu0 %4518 }
 0x362   : > { %v4521_v35 = vunpack.i.h.bf16 %v4519_v34  ;;  %v4520_v36 = vunpack.i.l.bf16 %v4519_v34 }
 0x364   : > { %v4349_v37 = vpack.c.bf16 %v4521_v35, %v4520_v36 }
 0x365   : > { %v4524_v38 = vpop.permute.xlu0 %4523 }
 0x366   : > { %4351 = vmatprep.subr.msk.bf16.mxu1 %vm5553_vm1, %v4349_v37  ;;  %v4526_v42 = vunpack.i.h.bf16 %v4524_v38  ;;  %v4525_v43 = vunpack.i.l.bf16 %v4524_v38 }
 0x367   : > { %4354 = vmatpush3.bf16.xpose.msk.msra.mxu1 %vm5553_vm1, %v4349_v37 }
 0x368   : > { %v4361_v50 = vpack.c.bf16 %v4526_v42, %v4525_v43 }
 0x369   : > { %v866_v40 = vpop.permute.xlu0 %865 }
 0x36a   : > { %v4529_v41 = vpop.permute.xlu1 %4528 }
 0x36b   : > { %v4531_v44 = vunpack.i.h.bf16 %v4529_v41  ;;  %v4530_v45 = vunpack.i.l.bf16 %v4529_v41 }
 0x36d   : > { %v4355_v47 = vpack.c.bf16 %v4531_v44, %v4530_v45  ;;  %v4534_v48 = vpop.permute.xlu0 %4533 }
 0x36e   : > { %v868_v49 = vpop.permute.xlu1 %867  ;;  %4204 = vmatmul.mubr.msk.f32.vlgmr.msra.gmra.mrb[8].mxu1 %vm953_vm0, %v864_v39  ;;  %v4536_v53 = vunpack.i.h.bf16 %v4534_v48  ;;  %v4535_v54 = vunpack.i.l.bf16 %v4534_v48 }
 0x36f   : > { %4357 = vmatprep.subr.msk.bf16.mxu1 %vm5553_vm1, %v4355_v47  ;;  %4210 = vmatprep.mubr.msk.f32.mxu1 %vm953_vm0, %v866_v40 }
 0x370   : > { %4360 = vmatpush3.bf16.xpose.msk.msra.mxu1 %vm5553_vm1, %v4355_v47  ;;  %v4373_v60 = vpack.c.bf16 %v4536_v53, %v4535_v54 }
 0x371   : > { %4363 = vmatprep.subr.msk.bf16.mxu1 %vm5553_vm1, %v4361_v50  ;;  %v870_v51 = vpop.permute.xlu0 %869 }
 0x372   : > { %v4539_v52 = vpop.permute.xlu1 %4538 }
 0x373   : > { %v4541_v55 = vunpack.i.h.bf16 %v4539_v52  ;;  %v4540_v56 = vunpack.i.l.bf16 %v4539_v52 }
 0x375   : > { %v4367_v57 = vpack.c.bf16 %v4541_v55, %v4540_v56  ;;  %v874_v58 = vpop.permute.xlu0 %873 }
 0x376   : > { %v872_v59 = vpop.permute.xlu1 %871  ;;  %4224 = vmatprep.mubr.msk.f32.mxu0 %vm953_vm0, %v874_v58 }
 0x377   : > { %4211 = vmatmul.mubr.msk.f32.vlgmr.msra.gmra.mrb[10].mxu1 %vm953_vm0, %v868_v49  ;;  %4369 = vmatprep.subr.msk.bf16.mxu0 %vm5553_vm1, %v4367_v57 }
 0x378   : > { %4366 = vmatpush3.bf16.xpose.msk.msra.mxu1 %vm5553_vm1, %v4361_v50  ;;  %4217 = vmatprep.mubr.msk.f32.mxu1 %vm953_vm0, %v870_v51 }
 0x379   : > { %4372 = vmatpush3.bf16.xpose.msk.msra.mxu0 %vm5553_vm1, %v4367_v57  ;;  %4375 = vmatprep.subr.msk.bf16.mxu1 %vm5553_vm1, %v4373_v60  ;;  %v878_v61 = vpop.permute.xlu0 %877 }
 0x37a   : > { %v4544_v62 = vpop.permute.xlu1 %4543 }
 0x37b   : > { %v4546_v63 = vunpack.i.h.bf16 %v4544_v62  ;;  %v4545_v0 = vunpack.i.l.bf16 %v4544_v62 }
 0x37d   : > { %v4379_v1 = vpack.c.bf16 %v4546_v63, %v4545_v0  ;;  %v882_v3 = vpop.permute.xlu0 %881 }
 0x37e   : > { %v876_v2 = vpop.permute.xlu1 %875 }
 0x37f   : > { %4218 = vmatmul.mubr.msk.f32.vlgmr.msra.gmra.mrb[12].mxu1 %vm953_vm0, %v872_v59  ;;  %4381 = vmatprep.subr.msk.bf16.mxu0 %vm5553_vm1, %v4379_v1 }
 0x380   : > { %4225 = vmatmul.mubr.msk.f32.vlgmr.msra.gmra.mrb[8].mxu0 %vm953_vm0, %v876_v2  ;;  %4378 = vmatpush3.bf16.xpose.msk.msra.mxu1 %vm5553_vm1, %v4373_v60 }
 0x381   : > { %4231 = vmatprep.mubr.msk.f32.mxu1 %vm953_vm0, %v878_v61  ;;  %4384 = vmatpush3.bf16.xpose.msk.msra.mxu0 %vm5553_vm1, %v4379_v1 }
 0x382   : > { %4238 = vmatprep.mubr.msk.f32.mxu0 %vm953_vm0, %v882_v3  ;;  %4386 = vmatprep.subr.bf16.mxu1 %v5567_v26  ;;  %v880_v4 = vpop.permute.xlu1 %879 }
 0x386   : > { %v884_v5 = vpop.permute.xlu1 %883 }
 0x387   : > { %4232 = vmatmul.mubr.msk.f32.vlgmr.msra.gmra.mrb[14].mxu1 %vm953_vm0, %v880_v4 }
 0x388   : > { %4239 = vmatmul.mubr.msk.f32.vlgmr.msra.gmra.mrb[10].mxu0 %vm953_vm0, %v884_v5  ;;  %4388 = vmatpush3.bf16.msra.mxu1 %v5567_v26 }
 0x389   : > { %4390 = vmatprep.subr.bf16.mxu1 %v5563_v23 }
 0x3ca   : > { %v4191_v13 = vpop.f32.mrb[4].mxu1 }
 0x3cb   : > { %v5632_v14 = vadd.f32 %v4191_v13, %v536_v11  ;;  %v1028_v15 = vpop.f32.mrb[5].mxu1 }
 0x3cc   : > { %v5634_v16 = vadd.f32 %v1028_v15, %v535_v12 }
 0x3cd   : > { %v1622_v17 = vsel %vm1618_vm4, %v5632_v14, -inf }
 0x3ce   : > { %1623 = vmax.xlane.f32.xlu1 %v1622_v17  ;;  %v1619_v18 = vsel %vm1618_vm4, %v5634_v16, -inf }
 0x3cf   : > { %1620 = vmax.xlane.f32.xlu0 %v1619_v18 }
 0x3d3   : > { %v4198_v19 = vpop.f32.mrb[6].mxu1 }
 0x3d4   : > { %v5640_v20 = vadd.f32 %v4198_v19, %v536_v11  ;;  %v1111_v21 = vpop.f32.mrb[7].mxu1 }
 0x3d5   : > { %v5642_v22 = vadd.f32 %v1111_v21, %v535_v12 }
 0x3d6   : > { %v1628_v25 = vsel %vm1618_vm4, %v5640_v20, -inf }
 0x3d7   : > { %1629 = vmax.xlane.f32.xlu0 %v1628_v25  ;;  %v1625_v26 = vsel %vm1618_vm4, %v5642_v22, -inf }
 0x3db   : > { %1626 = vmax.xlane.f32.xlu0 %v1625_v26 }
 0x441   : > { %v4205_v28 = vpop.f32.mrb[8].mxu1 }
 0x442   : > { %v5648_v29 = vadd.f32 %v4205_v28, %v536_v11  ;;  %v1194_v30 = vpop.f32.mrb[9].mxu1 }
 0x443   : > { %v5650_v31 = vadd.f32 %v1194_v30, %v535_v12 }
 0x444   : > { %v1634_v32 = vsel %vm1618_vm4, %v5648_v29, -inf }
 0x445   : > { %1635 = vmax.xlane.f32.xlu1 %v1634_v32  ;;  %v1631_v33 = vsel %vm1618_vm4, %v5650_v31, -inf }
 0x446   : > { %1632 = vmax.xlane.f32.xlu0 %v1631_v33 }
 0x44a   : > { %v4212_v34 = vpop.f32.mrb[10].mxu1 }
 0x44b   : > { %v5656_v35 = vadd.f32 %v4212_v34, %v536_v11  ;;  %v1277_v36 = vpop.f32.mrb[11].mxu1 }
 0x44c   : > { %v5658_v37 = vadd.f32 %v1277_v36, %v535_v12 }
 0x44d   : > { %v1640_v38 = vsel %vm1618_vm4, %v5656_v35, -inf }
 0x44e   : > { %1641 = vmax.xlane.f32.xlu1 %v1640_v38  ;;  %v1637_v39 = vsel %vm1618_vm4, %v5658_v37, -inf }
 0x44f   : > { %1638 = vmax.xlane.f32.xlu0 %v1637_v39 }
 0x452   : > { %v4219_v40 = vpop.f32.mrb[12].mxu1 }
 0x453   : > { %v4226_v41 = vpop.f32.mrb[8].mxu0  ;;  %v1360_v42 = vpop.f32.mrb[13].mxu1  ;;  %v5668_v47 = vadd.f32 %v4219_v40, %v536_v11 }
 0x454   : > { %v5664_v43 = vadd.f32 %v4226_v41, %v536_v11  ;;  %v1443_v44 = vpop.f32.mrb[9].mxu0  ;;  %v5672_v49 = vadd.f32 %v1360_v42, %v535_v12 }
 0x455   : > { %v5666_v45 = vadd.f32 %v1443_v44, %v535_v12  ;;  %v1646_v51 = vsel %vm1618_vm4, %v5668_v47, -inf }
 0x456   : > { %v1652_v48 = vsel %vm1618_vm4, %v5664_v43, -inf  ;;  %v1643_v55 = vsel %vm1618_vm4, %v5672_v49, -inf }
 0x457   : > { %1653 = vmax.xlane.f32.xlu1 %v1652_v48  ;;  %v1649_v50 = vsel %vm1618_vm4, %v5666_v45, -inf }
 0x458   : > { %1650 = vmax.xlane.f32.xlu0 %v1649_v50 }
 0x45a   : > { %v4233_v52 = vpop.f32.mrb[14].mxu1 }
 0x45b   : > { %v4240_v53 = vpop.f32.mrb[10].mxu0  ;;  %1647 = vmax.xlane.f32.xlu1 %v1646_v51  ;;  %v1526_v54 = vpop.f32.mrb[15].mxu1  ;;  %v5684_v59 = vadd.f32 %v4233_v52, %v536_v11 }
 0x45c   : > { %v5680_v56 = vadd.f32 %v4240_v53, %v536_v11  ;;  %v1609_v57 = vpop.f32.mrb[11].mxu0  ;;  %1644 = vmax.xlane.f32.xlu0 %v1643_v55  ;;  %v5688_v61 = vadd.f32 %v1526_v54, %v535_v12  ;;  %v1621_v1 = vpop.xlane.xlu0 %1620 }
 0x45d   : > { %v5682_v58 = vadd.f32 %v1609_v57, %v535_v12  ;;  %v1658_v63 = vsel %vm1618_vm4, %v5684_v59, -inf  ;;  %v1667_v3 = vsub.f32 %v5634_v16, %v1621_v1  ;;  %v1624_v5 = vpop.xlane.xlu1 %1623 }
 0x45e   : > { %v1664_v60 = vsel %vm1618_vm4, %v5680_v56, -inf  ;;  %v1655_v0 = vsel %vm1618_vm4, %v5688_v61, -inf  ;;  %v1668_v8 = vsub.f32 %v5632_v14, %v1624_v5 }
 0x45f   : > { %1665 = vmax.xlane.f32.xlu1 %v1664_v60  ;;  %v1661_v62 = vsel %vm1618_vm4, %v5682_v58, -inf  ;;  %v1683_v6 = vmul.f32 1.442695, %v1667_v3 }
 0x460   : > { %1662 = vmax.xlane.f32.xlu0 %v1661_v62  ;;  %v1685_v10 = vmul.f32 1.442695, %v1668_v8 }
 0x461   : > { %4735 = vpow2.f32 %v1683_v6 }
 0x463   : > { %1659 = vmax.xlane.f32.xlu1 %v1658_v63 }
 0x464   : > { %1656 = vmax.xlane.f32.xlu0 %v1655_v0  ;;  %v1630_v2 = vpop.xlane.xlu0 %1629 }
 0x465   : > { %v1670_v11 = vsub.f32 %v5640_v20, %v1630_v2 }
 0x467   : > { %v1689_v12 = vmul.f32 1.442695, %v1670_v11 }
 0x468   : > { %v1627_v4 = vpop.xlane.xlu0 %1626 }
 0x469   : > { %v1669_v7 = vsub.f32 %v5642_v22, %v1627_v4 }
 0x46b   : > { %v1687_v9 = vmul.f32 1.442695, %v1669_v7  ;;  %v5708_v13 = vpop.eup %4735 }
 0x46c   : > { %v1715_v15 = vsel %vm1618_vm4, %v5708_v13, 0.0 }
 0x46d   : > { %4737 = vpow2.f32 %v1687_v9 }
 0x46e   : > { %4739 = vpow2.f32 %v1685_v10 }
 0x46f   : > { %4741 = vpow2.f32 %v1689_v12 }
 0x474   : > { %4553 = vrot.lane.b32.xlu1 %v5565_v24, %s5124_s25 }
 0x477   : > { %v5712_v16 = vpop.eup %4737 }
 0x478   : > { %4558 = vrot.lane.b32.xlu1 %v5569_v27, %s5125_s24  ;;  %v5714_v17 = vpop.eup %4739  ;;  %v1721_v14 = vsel %vm1618_vm4, %v5712_v16, 0.0 }
 0x479   : > { %v1718_v18 = vsel %vm1618_vm4, %v5714_v17, 0.0  ;;  %v5720_v19 = vpop.eup %4741 }
 0x47a   : > { %4548 = vrot.lane.b32.xlu0 %v5569_v27, %s5124_s25  ;;  %v1724_v20 = vsel %vm1618_vm4, %v5720_v19, 0.0 }
 0x47c   : > { %4563 = vrot.lane.b32.xlu1 %v5565_v24, %s5125_s24 }
 0x499   : > { %1716 = vadd.xlane.f32.xlu0 %v1715_v15 }
 0x49d   : > { %1722 = vadd.xlane.f32.xlu0 %v1721_v14 }
 0x4a0   : > { %1719 = vadd.xlane.f32.xlu1 %v1718_v18 }
 0x4a4   : > { %1725 = vadd.xlane.f32.xlu1 %v1724_v20 }
 0x4d2   : > { %v1636_v21 = vpop.xlane.xlu1 %1635 }
 0x4d3   : > { %v1672_v22 = vsub.f32 %v5648_v29, %v1636_v21  ;;  %v1633_v25 = vpop.xlane.xlu0 %1632 }
 0x4d4   : > { %v1671_v26 = vsub.f32 %v5650_v31, %v1633_v25 }
 0x4d5   : > { %v1693_v28 = vmul.f32 1.442695, %v1672_v22 }
 0x4d6   : > { %v1691_v30 = vmul.f32 1.442695, %v1671_v26 }
 0x4d7   : > { %4743 = vpow2.f32 %v1693_v28 }
 0x4d8   : > { %4745 = vpow2.f32 %v1691_v30 }
 0x4db   : > { %v1642_v32 = vpop.xlane.xlu1 %1641 }
 0x4dc   : > { %v1674_v33 = vsub.f32 %v5656_v35, %v1642_v32  ;;  %v1639_v34 = vpop.xlane.xlu0 %1638 }
 0x4dd   : > { %v1673_v36 = vsub.f32 %v5658_v37, %v1639_v34 }
 0x4de   : > { %v1697_v38 = vmul.f32 1.442695, %v1674_v33 }
 0x4df   : > { %v1695_v39 = vmul.f32 1.442695, %v1673_v36 }
 0x4e0   : > { %4747 = vpow2.f32 %v1697_v38 }
 0x4e1   : > { %v5728_v40 = vpop.eup %4743  ;;  %4749 = vpow2.f32 %v1695_v39 }
 0x4e2   : > { %v5730_v29 = vpop.eup %4745  ;;  %v1730_v31 = vsel %vm1618_vm4, %v5728_v40, 0.0 }
 0x4e3   : > { %1731 = vadd.xlane.f32.xlu1 %v1730_v31  ;;  %v1727_v41 = vsel %vm1618_vm4, %v5730_v29, 0.0 }
 0x4e4   : > { %v1654_v42 = vpop.xlane.xlu1 %1653  ;;  %1728 = vadd.xlane.f32.xlu0 %v1727_v41 }
 0x4e5   : > { %v1678_v35 = vsub.f32 %v5664_v43, %v1654_v42  ;;  %v1651_v37 = vpop.xlane.xlu0 %1650 }
 0x4e6   : > { %v1677_v44 = vsub.f32 %v5666_v45, %v1651_v37 }
 0x4e7   : > { %v1705_v48 = vmul.f32 1.442695, %v1678_v35 }
 0x4e8   : > { %v1703_v50 = vmul.f32 1.442695, %v1677_v44  ;;  %v1648_v51 = vpop.xlane.xlu1 %1647 }
 0x4e9   : > { %4751 = vpow2.f32 %v1705_v48  ;;  %v1676_v52 = vsub.f32 %v5668_v47, %v1648_v51  ;;  %v1645_v53 = vpop.xlane.xlu0 %1644 }
 0x4ea   : > { %v5739_v54 = vpop.eup %4747  ;;  %4753 = vpow2.f32 %v1703_v50  ;;  %v1675_v55 = vsub.f32 %v5672_v49, %v1645_v53 }
 0x4eb   : > { %v5742_v57 = vpop.eup %4749  ;;  %v1701_v60 = vmul.f32 1.442695, %v1676_v52  ;;  %v1736_v43 = vsel %vm1618_vm4, %v5739_v54, 0.0 }
 0x4ec   : > { %v1699_v62 = vmul.f32 1.442695, %v1675_v55  ;;  %v1666_v45 = vpop.xlane.xlu1 %1665  ;;  %1737 = vadd.xlane.f32.xlu1 %v1736_v43  ;;  %v1733_v63 = vsel %vm1618_vm4, %v5742_v57, 0.0 }
 0x4ed   : > { %4755 = vpow2.f32 %v1701_v60  ;;  %v1682_v47 = vsub.f32 %v5680_v56, %v1666_v45  ;;  %v1663_v0 = vpop.xlane.xlu0 %1662  ;;  %1734 = vadd.xlane.f32.xlu0 %v1733_v63 }
 0x4ee   : > { %4757 = vpow2.f32 %v1699_v62  ;;  %v1681_v49 = vsub.f32 %v5682_v58, %v1663_v0 }
 0x4ef   : > { %v1713_v1 = vmul.f32 1.442695, %v1682_v47 }
 0x4f0   : > { %v1711_v2 = vmul.f32 1.442695, %v1681_v49  ;;  %v1660_v3 = vpop.xlane.xlu1 %1659 }
 0x4f1   : > { %4759 = vpow2.f32 %v1713_v1  ;;  %v1680_v4 = vsub.f32 %v5684_v59, %v1660_v3  ;;  %v1657_v5 = vpop.xlane.xlu0 %1656 }
 0x4f2   : > { %4761 = vpow2.f32 %v1711_v2  ;;  %v1679_v6 = vsub.f32 %v5688_v61, %v1657_v5 }
 0x4f3   : > { %v5752_v7 = vpop.eup %4751  ;;  %v1709_v8 = vmul.f32 1.442695, %v1680_v4 }
 0x4f4   : > { %v5754_v9 = vpop.eup %4753  ;;  %v1707_v56 = vmul.f32 1.442695, %v1679_v6  ;;  %v4554_v10 = vpop.permute.xlu1 %4553  ;;  %v1748_v58 = vsel %vm1618_vm4, %v5752_v7, 0.0 }
 0x4f5   : > { %4763 = vpow2.f32 %v1709_v8  ;;  %1749 = vadd.xlane.f32.xlu1 %v1748_v58  ;;  %v4549_v11 = vpop.permute.xlu0 %4548  ;;  %v1745_v59 = vsel %vm1618_vm4, %v5754_v9, 0.0  ;;  %v4556_v52 = vunpack.i.h.bf16 %v4554_v10 }
 0x4f6   : > { %4765 = vpow2.f32 %v1707_v56  ;;  %v4551_v12 = vunpack.i.h.bf16 %v4549_v11  ;;  %v4550_v15 = vunpack.i.l.bf16 %v4549_v11  ;;  %1746 = vadd.xlane.f32.xlu0 %v1745_v59 }
 0x4f7   : > { %v5760_v61 = vpop.eup %4755 }
 0x4f8   : > { %v5762_v14 = vpop.eup %4757  ;;  %v4393_v18 = vpack.c.bf16 %v4551_v12, %v4550_v15  ;;  %v4559_v20 = vpop.permute.xlu1 %4558  ;;  %v1742_v21 = vsel %vm1618_vm4, %v5760_v61, 0.0 }
 0x4f9   : > { %v4561_v22 = vunpack.i.h.bf16 %v4559_v20  ;;  %v4560_v25 = vunpack.i.l.bf16 %v4559_v20  ;;  %1743 = vadd.xlane.f32.xlu1 %v1742_v21  ;;  %v1739_v26 = vsel %vm1618_vm4, %v5762_v14, 0.0 }
 0x4fa   : > { %1740 = vadd.xlane.f32.xlu0 %v1739_v26  ;;  %4394 = vmatprep.subr.bf16.mxu0 %v4393_v18 }
 0x4fb   : > { %v5768_v28 = vpop.eup %4759  ;;  %v4401_v30 = vpack.c.bf16 %v4561_v22, %v4560_v25  ;;  %4396 = vmatpush3.bf16.msra.mxu0 %v4393_v18 }
 0x4fc   : > { %v5770_v32 = vpop.eup %4761  ;;  %v1760_v33 = vsel %vm1618_vm4, %v5768_v28, 0.0  ;;  %v4564_v42 = vpop.permute.xlu1 %4563 }
 0x4fd   : > { %1761 = vadd.xlane.f32.xlu1 %v1760_v33  ;;  %4402 = vmatprep.subr.bf16.mxu0 %v4401_v30  ;;  %v1757_v34 = vsel %vm1618_vm4, %v5770_v32, 0.0  ;;  %v4566_v43 = vunpack.i.h.bf16 %v4564_v42  ;;  %v4565_v62 = vunpack.i.l.bf16 %v4564_v42 }
 0x4fe   : > { %1758 = vadd.xlane.f32.xlu0 %v1757_v34 }
 0x4ff   : > { %v5776_v36 = vpop.eup %4763  ;;  %v4405_v63 = vpack.c.bf16 %v4566_v43, %v4565_v62  ;;  %v4644_v62 = vld [vmem:[%s5470_s21 + $0x28] sm:$0xff]  }
 0x500   : > { %v5778_v38 = vpop.eup %4765  ;;  %v1754_v39 = vsel %vm1618_vm4, %v5776_v36, 0.0 }
 0x501   : > { %1755 = vadd.xlane.f32.xlu1 %v1754_v39  ;;  %v1751_v31 = vsel %vm1618_vm4, %v5778_v38, 0.0 }
 0x502   : > { %1752 = vadd.xlane.f32.xlu0 %v1751_v31 }
 0x512   : > { %4573 = vrot.lane.b32.xlu1 %v5565_v24, %s5126_s15  ;;  %v4555_v24 = vunpack.i.l.bf16 %v4554_v10 }
 0x514   : > { %v4397_v60 = vpack.c.bf16 %v4556_v52, %v4555_v24  ;;  %v4641_v24 = vld [vmem:[%s5470_s21 + $0x10] sm:$0xff]  }
 0x518   : > { %4568 = vrot.lane.b32.xlu0 %v5569_v27, %s5126_s15 }
 0x526   : > { %v1717_v41 = vpop.xlane.xlu0 %1716 }
 0x527   : > { %4767 = vrcp.f32 %v1717_v41 }
 0x52a   : > { %v1723_v35 = vpop.xlane.xlu0 %1722 }
 0x52b   : > { %4769 = vrcp.f32 %v1723_v35 }
 0x52d   : > { %v1720_v37 = vpop.xlane.xlu1 %1719 }
 0x52e   : > { %4771 = vrcp.f32 %v1720_v37 }
 0x531   : > { %v4768_v44 = vpop.eup %4767  ;;  %v1726_v48 = vpop.xlane.xlu1 %1725 }
 0x532   : > { %4773 = vrcp.f32 %v1726_v48  ;;  %v1764_v50 = vmul.f32 %v4768_v44, %v5708_v13 }
 0x534   : > { %4245 = vmatprep.mubr.msk.f32.mxu1 %vm1618_vm4, %v1764_v50  ;;  %v4639_v50 = vld [vmem:[%s5470_s21] sm:$0xff]  }
 0x535   : > { %v4770_v51 = vpop.eup %4769 }
 0x536   : > { %v1768_v55 = vmul.f32 %v4770_v51, %v5712_v16  ;;  %v4640_v51 = vld [vmem:[%s5470_s21 + $0x8] sm:$0xff]  }
 0x538   : > { %v4772_v53 = vpop.eup %4771 }
 0x539   : > { %v1766_v27 = vmul.f32 %v4772_v53, %v5714_v17  ;;  %v4642_v53 = vld [vmem:[%s5470_s21 + $0x18] sm:$0xff]  }
 0x53b   : > { %4246 = vmatmul.mubr.msk.f32.vlgmr.msra.gmra.mrb[16].mxu1 %vm1618_vm4, %v1766_v27 }
 0x53c   : > { %v4774_v45 = vpop.eup %4773  ;;  %4392 = vmatpush3.bf16.msra.mxu1 %v5563_v23  ;;  %4252 = vmatprep.mubr.msk.f32.mxu1 %vm1618_vm4, %v1768_v55 }
 0x53d   : > { %v1770_v13 = vmul.f32 %v4774_v45, %v5720_v19  ;;  %4398 = vmatprep.subr.bf16.mxu1 %v4397_v60 }
 0x53f   : > { %4253 = vmatmul.mubr.msk.f32.vlgmr.msra.gmra.mrb[18].mxu1 %vm1618_vm4, %v1770_v13  ;;  %v4645_v13 = vld [vmem:[%s5470_s21 + $0x30] sm:$0xff]  }
 0x540   : > { %4400 = vmatpush3.bf16.msra.mxu1 %v4397_v60  ;;  %v4643_v60 = vld [vmem:[%s5470_s21 + $0x20] sm:$0xff]  }
 0x541   : > { %4406 = vmatprep.subr.bf16.mxu1 %v4405_v63 }
 0x570   : > { %v1732_v17 = vpop.xlane.xlu1 %1731 }
 0x571   : > { %4775 = vrcp.f32 %v1732_v17  ;;  %v1729_v16 = vpop.xlane.xlu0 %1728 }
 0x572   : > { %4777 = vrcp.f32 %v1729_v16  ;;  %v4646_v16 = vld [vmem:[%s5470_s21 + $0x38] sm:$0xff]  }
 0x579   : > { %v1738_v47 = vpop.xlane.xlu1 %1737 }
 0x57a   : > { %4779 = vrcp.f32 %v1738_v47  ;;  %v1735_v0 = vpop.xlane.xlu0 %1734 }
 0x57b   : > { %v4776_v49 = vpop.eup %4775  ;;  %4781 = vrcp.f32 %v1735_v0 }
 0x57c   : > { %v4778_v23 = vpop.eup %4777  ;;  %v1774_v19 = vmul.f32 %v4776_v49, %v5728_v40 }
 0x57d   : > { %v1772_v1 = vmul.f32 %v4778_v23, %v5730_v29 }
 0x57f   : > { %4259 = vmatprep.mubr.msk.f32.mxu0 %vm1618_vm4, %v1772_v1 }
 0x580   : > { %4260 = vmatmul.mubr.msk.f32.vlgmr.msra.gmra.mrb[12].mxu0 %vm1618_vm4, %v1774_v19 }
 0x581   : > { %4404 = vmatpush3.bf16.msra.mxu0 %v4401_v30 }
 0x582   : > { %v1750_v2 = vpop.xlane.xlu1 %1749 }
 0x583   : > { %4783 = vrcp.f32 %v1750_v2  ;;  %v1747_v3 = vpop.xlane.xlu0 %1746 }
 0x584   : > { %v4780_v4 = vpop.eup %4779  ;;  %4785 = vrcp.f32 %v1747_v3 }
 0x585   : > { %v4782_v5 = vpop.eup %4781  ;;  %v1778_v56 = vmul.f32 %v4780_v4, %v5739_v54 }
 0x586   : > { %v1744_v6 = vpop.xlane.xlu1 %1743  ;;  %v1776_v8 = vmul.f32 %v4782_v5, %v5742_v57 }
 0x587   : > { %4787 = vrcp.f32 %v1744_v6  ;;  %v1741_v29 = vpop.xlane.xlu0 %1740 }
 0x588   : > { %4789 = vrcp.f32 %v1741_v29  ;;  %4266 = vmatprep.mubr.msk.f32.mxu1 %vm1618_vm4, %v1776_v8 }
 0x589   : > { %4267 = vmatmul.mubr.msk.f32.vlgmr.msra.gmra.mrb[20].mxu1 %vm1618_vm4, %v1778_v56 }
 0x58a   : > { %v1762_v40 = vpop.xlane.xlu1 %1761  ;;  %4408 = vmatpush3.bf16.msra.mxu1 %v4405_v63 }
 0x58b   : > { %4791 = vrcp.f32 %v1762_v40  ;;  %v1759_v10 = vpop.xlane.xlu0 %1758 }
 0x58c   : > { %4793 = vrcp.f32 %v1759_v10 }
 0x58d   : > { %v4784_v58 = vpop.eup %4783 }
 0x58e   : > { %v4786_v11 = vpop.eup %4785  ;;  %v1756_v59 = vpop.xlane.xlu1 %1755  ;;  %v1786_v54 = vmul.f32 %v4784_v58, %v5752_v7 }
 0x58f   : > { %4795 = vrcp.f32 %v1756_v59  ;;  %v1753_v12 = vpop.xlane.xlu0 %1752  ;;  %v1784_v57 = vmul.f32 %v4786_v11, %v5754_v9 }
 0x590   : > { %4797 = vrcp.f32 %v1753_v12 }
 0x591   : > { %v4788_v15 = vpop.eup %4787  ;;  %4280 = vmatprep.mubr.msk.f32.mxu1 %vm1618_vm4, %v1784_v57 }
 0x592   : > { %v4790_v18 = vpop.eup %4789  ;;  %v4574_v20 = vpop.permute.xlu1 %4573  ;;  %4281 = vmatmul.mubr.msk.f32.vlgmr.msra.gmra.mrb[22].mxu1 %vm1618_vm4, %v1786_v54  ;;  %v1782_v30 = vmul.f32 %v4788_v15, %v5760_v61 }
 0x593   : > { %v4576_v21 = vunpack.i.h.bf16 %v4574_v20  ;;  %v4575_v22 = vunpack.i.l.bf16 %v4574_v20  ;;  %v4569_v25 = vpop.permute.xlu0 %4568  ;;  %v1780_v26 = vmul.f32 %v4790_v18, %v5762_v14 }
 0x594   : > { %v4571_v33 = vunpack.i.h.bf16 %v4569_v25  ;;  %v4570_v34 = vunpack.i.l.bf16 %v4569_v25 }
 0x595   : > { %v4792_v9 = vpop.eup %4791  ;;  %v4413_v39 = vpack.c.bf16 %v4576_v21, %v4575_v22  ;;  %4273 = vmatprep.mubr.msk.f32.mxu0 %vm1618_vm4, %v1780_v26 }
 0x596   : > { %v4794_v7 = vpop.eup %4793  ;;  %v4409_v31 = vpack.c.bf16 %v4571_v33, %v4570_v34  ;;  %4274 = vmatmul.mubr.msk.f32.vlgmr.msra.gmra.mrb[14].mxu0 %vm1618_vm4, %v1782_v30  ;;  %v1794_v61 = vmul.f32 %v4792_v9, %v5768_v28 }
 0x597   : > { %4414 = vmatprep.subr.bf16.mxu1 %v4413_v39  ;;  %v1792_v41 = vmul.f32 %v4794_v7, %v5770_v32 }
 0x598   : > { %4410 = vmatprep.subr.bf16.mxu0 %v4409_v31  ;;  %4416 = vmatpush3.bf16.msra.mxu1 %v4413_v39 }
 0x599   : > { %v4796_v42 = vpop.eup %4795  ;;  %4412 = vmatpush3.bf16.msra.mxu0 %v4409_v31  ;;  %4294 = vmatprep.mubr.msk.f32.mxu1 %vm1618_vm4, %v1792_v41 }
 0x59a   : > { %v4798_v14 = vpop.eup %4797  ;;  %v1790_v37 = vmul.f32 %v4796_v42, %v5776_v36  ;;  %4297 = vmatprep.subr.bf16.mxu0 %v4639_v50 }
 0x59b   : > { %4295 = vmatmul.mubr.msk.f32.vlgmr.msra.gmra.mrb[24].mxu1 %vm1618_vm4, %v1794_v61  ;;  %v1788_v35 = vmul.f32 %v4798_v14, %v5778_v38 }
 0x59c   : > { %2905 = vmatprep.mubr.bf16.mxu1 %v5123_v46 }
 0x59d   : > { %4287 = vmatprep.mubr.msk.f32.mxu0 %vm1618_vm4, %v1788_v35 }
 0x59e   : > { %4288 = vmatmul.mubr.msk.f32.vlgmr.msra.gmra.mrb[16].mxu0 %vm1618_vm4, %v1790_v37 }
 0x59f   : > { %4298 = vmatpush3.bf16.msra.mxu0 %v4639_v50 }
 0x5a0   : > { %4299 = vmatprep.subr.bf16.mxu0 %v4640_v51 }
 0x5a3   : > { %4300 = vmatpush3.bf16.msra.mxu0 %v4640_v51  ;;  %v4840_v51 = vld [vmem:[#allocation2 + $0x8] sm:$0xff] }
 0x5a4   : > { %4301 = vmatprep.subr.bf16.mxu0 %v4641_v24 }
 0x5a7   : > { %4302 = vmatpush3.bf16.msra.mxu0 %v4641_v24  ;;  %v4842_v24 = vld [vmem:[#allocation2 + $0x18] sm:$0xff] }
 0x5a8   : > { %4303 = vmatprep.subr.bf16.mxu0 %v4642_v53 }
 0x5ab   : > { %4304 = vmatpush3.bf16.msra.mxu0 %v4642_v53 }
 0x5ac   : > { %4305 = vmatprep.subr.bf16.mxu0 %v4643_v60 }
 0x5af   : > { %4306 = vmatpush3.bf16.msra.mxu0 %v4643_v60  ;;  %v4650_v60 = vld [vmem:[%s5472_s7 + $0x8] ss:$16 sps:$4 sm:$0xff]  }
 0x5b0   : > { %4307 = vmatprep.subr.bf16.mxu0 %v4644_v62 }
 0x5b3   : > { %4308 = vmatpush3.bf16.msra.mxu0 %v4644_v62  ;;  %v4655_v62 = vld [vmem:[%s5472_s7 + $0x24] ss:$16 sps:$4 sm:$0xff]  }
 0x5b4   : > { %4309 = vmatprep.subr.bf16.mxu0 %v4645_v13 }
 0x5b7   : > { %4310 = vmatpush3.bf16.msra.mxu0 %v4645_v13  ;;  %v4653_v13 = vld [vmem:[%s5472_s7 + $0x20] ss:$16 sps:$4 sm:$0xff]  }
 0x5b8   : > { %4311 = vmatprep.subr.bf16.mxu0 %v4646_v16 }
 0x5bb   : > { %4312 = vmatpush3.bf16.msra.mxu0 %v4646_v16  ;;  %v4664_v16 = vld [vmem:[%s5472_s7 + $0x4c] ss:$16 sps:$4 sm:$0xff]  }
 0x60e   : > { %v5822_v32 = vpop.f32.mrb[16].mxu1 }
 0x60f   : > { %v5824_v28 = vpop.f32.mrb[17].mxu1 }
 0x612   : > { %v4254_v44 = vpop.f32.mrb[18].mxu1 }
 0x613   : > { %v1948_v48 = vpop.f32.mrb[19].mxu1 }
 0x653   : > { %v4261_v36 = vpop.f32.mrb[12].mxu0 }
 0x654   : > { %v2029_v38 = vpop.f32.mrb[13].mxu0 }
 0x655   : > { %v4577_v52 = vpack.i.bf16 %v4261_v36, %v2029_v38  ;;  %v4841_v38 = vld [vmem:[#allocation2 + $0x10] sm:$0xff] }
 0x657   : > { %4578 = vrot.lane.b32.xlu0 %v4577_v52, %s5126_s15 }
 0x65c   : > { %v4268_v27 = vpop.f32.mrb[20].mxu1 }
 0x65d   : > { %v2110_v55 = vpop.f32.mrb[21].mxu1 }
 0x65e   : > { %v4582_v43 = vpack.i.bf16 %v4268_v27, %v2110_v55  ;;  %v4647_v27 = vld [vmem:[%s5472_s7] ss:$16 sps:$4 sm:$0xff]   ;;  %v4649_v55 = vld [vmem:[%s5472_s7 + $0x4] ss:$16 sps:$4 sm:$0xff]  }
 0x65f   : > { %2873 = vmatprep.subr.bf16.mxu1 %v4649_v55 }
 0x660   : > { %4583 = vrot.lane.b32.xlu1 %v4582_v43, %s5126_s15  ;;  %v4652_v43 = vld [vmem:[%s5472_s7 + $0xc] ss:$16 sps:$4 sm:$0xff]   ;;  %2874 = vmatpush1.bf16.msra.mxu1 %v4647_v27 }
 0x661   : > { %2926 = vmatprep.subr.bf16.mxu0 %v4652_v43  ;;  %2875 = vmatprep.subr.bf16.mxu1 %v4655_v62  ;;  %v3934_v62 = vld [vmem:[%s510_s18] ss:$0 sm:$0xff] }
 0x664   : > { %2876 = vmatpush1.bf16.msra.mxu1 %v4653_v13 }
 0x665   : > { %v4282_v45 = vpop.f32.mrb[22].mxu1 }
 0x666   : > { %v2272_v63 = vpop.f32.mrb[23].mxu1 }
 0x667   : > { %v4587_v17 = vpack.i.bf16 %v4282_v45, %v2272_v63  ;;  %v4658_v45 = vld [vmem:[%s5472_s7 + $0x2c] ss:$16 sps:$4 sm:$0xff]   ;;  %v4656_v63 = vld [vmem:[%s5472_s7 + $0x28] ss:$16 sps:$4 sm:$0xff]  }
 0x669   : > { %4588 = vrot.lane.b32.xlu1 %v4587_v17, %s5125_s24  ;;  %v4275_v47 = vpop.f32.mrb[14].mxu0  ;;  %v4661_v17 = vld [vmem:[%s5472_s7 + $0x44] ss:$16 sps:$4 sm:$0xff]  }
 0x66a   : > { %v2191_v0 = vpop.f32.mrb[15].mxu0  ;;  %2877 = vmatprep.subr.bf16.mxu1 %v4661_v17 }
 0x66b   : > { %v4592_v49 = vpack.i.bf16 %v4275_v47, %v2191_v0  ;;  %v4659_v47 = vld [vmem:[%s5472_s7 + $0x40] ss:$16 sps:$4 sm:$0xff]   ;;  %v4662_v0 = vld [vmem:[%s5472_s7 + $0x48] ss:$16 sps:$4 sm:$0xff]  }
 0x66c   : > { %2878 = vmatpush1.bf16.msra.mxu1 %v4659_v47 }
 0x66d   : > { %4593 = vrot.lane.b32.xlu0 %v4592_v49, %s5125_s24 }
 0x66e   : > { %v4296_v23 = vpop.f32.mrb[24].mxu1 }
 0x66f   : > { %v2434_v1 = vpop.f32.mrb[25].mxu1 }
 0x670   : > { %v4602_v19 = vpack.i.bf16 %v4296_v23, %v2434_v1 }
 0x671   : > { %v4289_v2 = vpop.f32.mrb[16].mxu0 }
 0x672   : > { %4603 = vrot.lane.b32.xlu1 %v4602_v19, %s5124_s25  ;;  %v2353_v3 = vpop.f32.mrb[17].mxu0 }
 0x673   : > { %v4597_v4 = vpack.i.bf16 %v4289_v2, %v2353_v3 }
 0x675   : > { %4598 = vrot.lane.b32.xlu0 %v4597_v4, %s5124_s25 }
 0x6c9   : > { %v4579_v6 = vpop.permute.xlu0 %4578 }
 0x6ca   : > { %v4581_v11 = vunpack.i.h.bf16 %v4579_v6  ;;  %v4580_v59 = vunpack.i.l.bf16 %v4579_v6 }
 0x6cc   : > { %v2492_v26 = vsel %vm953_vm0, %v5822_v32, %v4581_v11  ;;  %v2491_v9 = vsel %vm953_vm0, %v5824_v28, %v4580_v59  ;;  %v4839_v28 = vld [vmem:[#allocation2] sm:$0xff] }
 0x6cd   : > { %v4667_v59 = vld [vmem:[%s5472_s7 + $0x64] ss:$16 sps:$4 sm:$0xff]  }
 0x6ce   : > { %2879 = vmatprep.subr.bf16.mxu1 %v4667_v59  ;;  %v4708_v59 = vld [vmem:[%s5478_s22 + $0xd8] sm:$0xff]  }
 0x6d2   : > { %v4584_v5 = vpop.permute.xlu1 %4583 }
 0x6d3   : > { %v4586_v56 = vunpack.i.h.bf16 %v4584_v5  ;;  %v4585_v29 = vunpack.i.l.bf16 %v4584_v5 }
 0x6d5   : > { %v2494_v12 = vsel %vm953_vm0, %v4254_v44, %v4586_v56  ;;  %v2493_v57 = vsel %vm953_vm0, %v1948_v48, %v4585_v29 }
 0x6db   : > { %v4589_v8 = vpop.permute.xlu1 %4588 }
 0x6dc   : > { %v4591_v40 = vunpack.i.h.bf16 %v4589_v8  ;;  %v4590_v10 = vunpack.i.l.bf16 %v4589_v8 }
 0x6de   : > { %v2499_v22 = vsel %vm2495_vm5, %v2494_v12, %v4591_v40  ;;  %v2498_v25 = vsel %vm2495_vm5, %v2493_v57, %v4590_v10  ;;  %v4670_v12 = vld [vmem:[%s5472_s7 + $0x6c] ss:$16 sps:$4 sm:$0xff]   ;;  %v4665_v57 = vld [vmem:[%s5472_s7 + $0x60] ss:$16 sps:$4 sm:$0xff]  }
 0x6df   : > { %v4594_v58 = vpop.permute.xlu0 %4593  ;;  %2880 = vmatpush1.bf16.msra.mxu1 %v4665_v57  ;;  %v4710_v57 = vld [vmem:[%s5478_s22 + $0x98] sm:$0xff]  }
 0x6e0   : > { %v4596_v15 = vunpack.i.h.bf16 %v4594_v58  ;;  %v4595_v18 = vunpack.i.l.bf16 %v4594_v58 }
 0x6e2   : > { %v2497_v41 = vsel %vm2495_vm5, %v2492_v26, %v4596_v15  ;;  %v2496_v42 = vsel %vm2495_vm5, %v2491_v9, %v4595_v18  ;;  %v4673_v15 = vld [vmem:[%s5472_s7 + $0x84] ss:$16 sps:$4 sm:$0xff]   ;;  %v4676_v18 = vld [vmem:[%s5472_s7 + $0x8c] ss:$16 sps:$4 sm:$0xff]   ;;  %v4677_v26 = vld [vmem:[%s5472_s7 + $0xa0] ss:$16 sps:$4 sm:$0xff]  }
 0x6e3   : > { %2881 = vmatprep.subr.bf16.mxu1 %v4673_v15  ;;  %v4686_v9 = vld [vmem:[%s5472_s7 + $0xc8] ss:$16 sps:$4 sm:$0xff]   ;;  %v4712_v15 = vld [vmem:[%s5478_s22 + $0xe0] sm:$0xff]  }
 0x6e4   : > { %v4604_v54 = vpop.permute.xlu1 %4603 }
 0x6e5   : > { %v4606_v20 = vunpack.i.h.bf16 %v4604_v54  ;;  %v4605_v21 = vunpack.i.l.bf16 %v4604_v54  ;;  %v4668_v54 = vld [vmem:[%s5472_s7 + $0x68] ss:$16 sps:$4 sm:$0xff]  }
 0x6e7   : > { %v2504_v30 = vsel %vm2500_vm6, %v2499_v22, %v4606_v20  ;;  %v2503_v33 = vsel %vm2500_vm6, %v2498_v25, %v4605_v21  ;;  %v4599_v34 = vpop.permute.xlu0 %4598  ;;  %v4671_v20 = vld [vmem:[%s5472_s7 + $0x80] ss:$16 sps:$4 sm:$0xff]   ;;  %v4674_v21 = vld [vmem:[%s5472_s7 + $0x88] ss:$16 sps:$4 sm:$0xff]   ;;  %v4679_v22 = vld [vmem:[%s5472_s7 + $0xa4] ss:$16 sps:$4 sm:$0xff]  }
 0x6e8   : > { %v2506_v39 = vpack.c.bf16 %v2504_v30, %v2503_v33  ;;  %v4601_v7 = vunpack.i.h.bf16 %v4599_v34  ;;  %v4600_v31 = vunpack.i.l.bf16 %v4599_v34  ;;  %2882 = vmatpush1.bf16.msra.mxu1 %v4671_v20  ;;  %v4682_v25 = vld [vmem:[%s5472_s7 + $0xac] ss:$16 sps:$4 sm:$0xff]   ;;  %v4680_v30 = vld [vmem:[%s5472_s7 + $0xa8] ss:$16 sps:$4 sm:$0xff]   ;;  %v4685_v33 = vld [vmem:[%s5472_s7 + $0xc4] ss:$16 sps:$4 sm:$0xff]  }
 0x6e9   : > { %2883 = vmatprep.subr.bf16.mxu1 %v4679_v22  ;;  %v4683_v34 = vld [vmem:[%s5472_s7 + $0xc0] ss:$16 sps:$4 sm:$0xff]   ;;  %v4716_v22 = vld [vmem:[%s5478_s22 + $0xe8] sm:$0xff]  }
 0x6ea   : > { %v2501_v61 = vsel %vm2500_vm6, %v2496_v42, %v4600_v31  ;;  %v2502_v14 = vsel %vm2500_vm6, %v2497_v41, %v4601_v7  ;;  %v4691_v7 = vld [vmem:[%s5472_s7 + $0xe4] ss:$16 sps:$4 sm:$0xff]   ;;  %v4694_v31 = vld [vmem:[%s5472_s7 + $0xec] ss:$16 sps:$4 sm:$0xff]   ;;  %v4689_v41 = vld [vmem:[%s5472_s7 + $0xe0] ss:$16 sps:$4 sm:$0xff]  }
 0x6eb   : > { %v2505_v35 = vpack.c.bf16 %v2502_v14, %v2501_v61  ;;  %v4692_v42 = vld [vmem:[%s5472_s7 + $0xe8] ss:$16 sps:$4 sm:$0xff]   ;;  %v4714_v20 = vld [vmem:[%s5478_s22 + $0xa0] sm:$0xff]  }
 0x6ec   : > { %2884 = vmatpush1.bf16.msra.mxu1 %v4677_v26  ;;  %v4718_v26 = vld [vmem:[%s5478_s22 + $0xa8] sm:$0xff]  }
 0x6ed   : > { %4313 = vmatprep.mubr.bf16.mxu0 %v2505_v35  ;;  %2885 = vmatprep.subr.bf16.mxu1 %v4685_v33  ;;  %v4720_v33 = vld [vmem:[%s5478_s22 + $0xf0] sm:$0xff]  }
 0x6ee   : > { %4314 = vmatmul.mubr.bf16.vlgmr.msra.gmra.mrb[20].mxu0 %v2506_v39  ;;  %v4688_v39 = vld [vmem:[%s5472_s7 + $0xcc] ss:$16 sps:$4 sm:$0xff]  }
 0x6ef   : > { %2958 = vmatprep.mubr.bf16.mxu0 %v5123_v46  ;;  %2927 = vmatpush1.bf16.msra.mxu0 %v4650_v60 }
 0x6f0   : > { %2928 = vmatprep.subr.bf16.mxu0 %v4658_v45  ;;  %2886 = vmatpush1.bf16.msra.mxu1 %v4683_v34  ;;  %v4721_v34 = vld [vmem:[%s5478_s22 + $0x30] sm:$0xff]  }
 0x6f1   : > { %2887 = vmatprep.subr.bf16.mxu1 %v4691_v7  ;;  %v4724_v7 = vld [vmem:[%s5478_s22 + $0xf8] sm:$0xff]  }
 0x6f3   : > { %2929 = vmatpush1.bf16.msra.mxu0 %v4656_v63 }
 0x6f4   : > { %2930 = vmatprep.subr.bf16.mxu0 %v4664_v16  ;;  %2888 = vmatpush1.bf16.msra.mxu1 %v4689_v41  ;;  %v4726_v41 = vld [vmem:[%s5478_s22 + $0xb8] sm:$0xff]  }
 0x6f7   : > { %2931 = vmatpush1.bf16.msra.mxu0 %v4662_v0 }
 0x6f8   : > { %2932 = vmatprep.subr.bf16.mxu0 %v4670_v12  ;;  %v4709_v12 = vld [vmem:[%s5478_s22 + $0x18] sm:$0xff]  }
 0x6fb   : > { %2933 = vmatpush1.bf16.msra.mxu0 %v4668_v54  ;;  %v4711_v54 = vld [vmem:[%s5478_s22 + $0x60] sm:$0xff]  }
 0x6fc   : > { %2934 = vmatprep.subr.bf16.mxu0 %v4676_v18  ;;  %v4713_v18 = vld [vmem:[%s5478_s22 + $0x20] sm:$0xff]  }
 0x6ff   : > { %2935 = vmatpush1.bf16.msra.mxu0 %v4674_v21  ;;  %v4715_v21 = vld [vmem:[%s5478_s22 + $0x68] sm:$0xff]  }
 0x700   : > { %2936 = vmatprep.subr.bf16.mxu0 %v4682_v25  ;;  %v4717_v25 = vld [vmem:[%s5478_s22 + $0x28] sm:$0xff]  }
 0x703   : > { %2937 = vmatpush1.bf16.msra.mxu0 %v4680_v30  ;;  %v4719_v30 = vld [vmem:[%s5478_s22 + $0x70] sm:$0xff]  }
 0x704   : > { %2938 = vmatprep.subr.bf16.mxu0 %v4688_v39  ;;  %v4723_v39 = vld [vmem:[%s5478_s22 + $0x78] sm:$0xff]  }
 0x707   : > { %2939 = vmatpush1.bf16.msra.mxu0 %v4686_v9  ;;  %v4722_v9 = vld [vmem:[%s5478_s22 + $0xb0] sm:$0xff]  }
 0x708   : > { %2940 = vmatprep.subr.bf16.mxu0 %v4694_v31  ;;  %v4725_v31 = vld [vmem:[%s5478_s22 + $0x38] sm:$0xff]  }
 0x70b   : > { %2941 = vmatpush1.bf16.msra.mxu0 %v4692_v42 }
 0x7c1   : > { %v4315_v37 = vpop.f32.mrb[20].mxu0 }
 0x7c2   : > { %v2605_v32 = vpop.f32.mrb[21].mxu0  ;;  %v5860_v52 = vadd.f32 %v4841_v38, %v4315_v37 }
 0x7c3   : > { %v5855_v44 = vadd.f32 %v4839_v28, %v2605_v32  ;;  %v4316_v48 = vpop.f32.mrb[22].mxu0 }
 0x7c4   : > { %v2608_v50 = vpop.f32.mrb[23].mxu0  ;;  %v5864_v53 = vadd.f32 %v4842_v24, %v4316_v48 }
 0x7c5   : > { %v5857_v36 = vadd.f32 %v4840_v51, %v2608_v50  ;;  %2625 = vadd.xlane.f32.xlu0 %v5855_v44 }
 0x7c7   : > { %2627 = vadd.xlane.f32.xlu1 %v5857_v36 }
 0x7c9   : > { %2629 = vadd.xlane.f32.xlu0 %v5860_v52 }
 0x7cd   : > { %2631 = vadd.xlane.f32.xlu0 %v5864_v53 }
 0x852   : > { %v2626_v49 = vpop.xlane.xlu0 %2625 }
 0x853   : > { %v2633_v23 = vmul.f32 0.0078125, %v2626_v49 }
 0x854   : > { %v2628_v1 = vpop.xlane.xlu1 %2627 }
 0x855   : > { %v5880_v19 = vsub.f32 %v5855_v44, %v2633_v23  ;;  %v2634_v2 = vmul.f32 0.0078125, %v2628_v1 }
 0x856   : > { %v2630_v3 = vpop.xlane.xlu0 %2629 }
 0x857   : > { %v5883_v4 = vsub.f32 %v5857_v36, %v2634_v2  ;;  %v2635_v5 = vmul.f32 0.0078125, %v2630_v3  ;;  %v2641_v6 = vmul.f32 %v5880_v19, %v5880_v19  ;;  %v4695_v2 = vld [vmem:[%s5478_s22 + $0x40] sm:$0xff]  }
 0x858   : > { %v4696_v3 = vld [vmem:[%s5478_s22 + $0xc0] sm:$0xff]   ;;  %4100 = vmatprep.subr.bf16.mxu1 %v4695_v2 }
 0x859   : > { %v5888_v8 = vsub.f32 %v5860_v52, %v2635_v5  ;;  %2645 = vadd.xlane.f32.xlu0 %v2641_v6  ;;  %v2642_v56 = vmul.f32 %v5883_v4, %v5883_v4  ;;  %4128 = vmatprep.subr.bf16.mxu0 %v4696_v3  ;;  %v4698_v5 = vld [vmem:[%s5478_s22 + $0x80] sm:$0xff]   ;;  %v4700_v6 = vld [vmem:[%s5478_s22 + $0xc8] sm:$0xff]  }
 0x85a   : > { %v2632_v29 = vpop.xlane.xlu0 %2631 }
 0x85b   : > { %v2636_v40 = vmul.f32 0.0078125, %v2632_v29  ;;  %2647 = vadd.xlane.f32.xlu1 %v2642_v56  ;;  %v2643_v10 = vmul.f32 %v5888_v8, %v5888_v8  ;;  %v4702_v56 = vld [vmem:[%s5478_s22 + $0x88] sm:$0xff]   ;;  %v4703_v29 = vld [vmem:[%s5478_s22 + $0x50] sm:$0xff]  }
 0x85d   : > { %v5895_v58 = vsub.f32 %v5864_v53, %v2636_v40  ;;  %2649 = vadd.xlane.f32.xlu0 %v2643_v10  ;;  %v4704_v40 = vld [vmem:[%s5478_s22 + $0xd0] sm:$0xff]  }
 0x85e   : > { %v4705_v10 = vld [vmem:[%s5478_s22 + $0x10] sm:$0xff]  }
 0x85f   : > { %v2644_v11 = vmul.f32 %v5895_v58, %v5895_v58 }
 0x861   : > { %2651 = vadd.xlane.f32.xlu1 %v2644_v11  ;;  %v4707_v11 = vld [vmem:[%s5478_s22 + $0x58] sm:$0xff]  }
 0x8e6   : > { %v2646_v61 = vpop.xlane.xlu0 %2645 }
 0x8e7   : > { %v2653_v14 = vmul.f32 0.0078125, %v2646_v61 }
 0x8e8   : > { %v2648_v35 = vpop.xlane.xlu1 %2647 }
 0x8e9   : > { %v2657_v37 = vadd.f32 1e-05, %v2653_v14  ;;  %v2654_v32 = vmul.f32 0.0078125, %v2648_v35 }
 0x8ea   : > { %v2650_v28 = vpop.xlane.xlu0 %2649 }
 0x8eb   : > { %4799 = vrsqrt.f32 %v2657_v37  ;;  %v2658_v48 = vadd.f32 1e-05, %v2654_v32  ;;  %v2655_v50 = vmul.f32 0.0078125, %v2650_v28 }
 0x8ed   : > { %4801 = vrsqrt.f32 %v2658_v48  ;;  %v2659_v51 = vadd.f32 1e-05, %v2655_v50 }
 0x8ee   : > { %v2652_v38 = vpop.xlane.xlu1 %2651 }
 0x8ef   : > { %v2656_v24 = vmul.f32 0.0078125, %v2652_v38  ;;  %4803 = vrsqrt.f32 %v2659_v51 }
 0x8f1   : > { %v2660_v27 = vadd.f32 1e-05, %v2656_v24 }
 0x8f3   : > { %4805 = vrsqrt.f32 %v2660_v27 }
 0x8f5   : > { %v4800_v55 = vpop.eup %4799 }
 0x8f6   : > { %v2665_v60 = vmul.f32 %v4800_v55, %v5880_v19 }
 0x8f7   : > { %v4802_v43 = vpop.eup %4801 }
 0x8f8   : > { %v2666_v45 = vmul.f32 %v4802_v43, %v5883_v4  ;;  %v2675_v13 = vmul.f32 %v3934_v62, %v2665_v60  ;;  %v4697_v4 = vld [vmem:[%s5478_s22] sm:$0xff]  }
 0x8f9   : > { %v4804_v17 = vpop.eup %4803 }
 0x8fa   : > { %v2676_v63 = vmul.f32 %v3934_v62, %v2666_v45  ;;  %v2667_v0 = vmul.f32 %v4804_v17, %v5888_v8  ;;  %v4701_v8 = vld [vmem:[%s5478_s22 + $0x8] sm:$0xff]  }
 0x8fc   : > { %v2679_v16 = vpack.c.bf16 %v2676_v63, %v2675_v13  ;;  %v2677_v1 = vmul.f32 %v3934_v62, %v2667_v0 }
 0x8fd   : > { %v4806_v47 = vpop.eup %4805 }
 0x8fe   : > { %2906 = vmatmul.mubr.bf16.vlgmr.msra.gmra.mrb[28].mxu1 %v2679_v16  ;;  %2959 = vmatmul.mubr.bf16.vlgmr.msra.gmra.mrb[24].mxu0 %v2679_v16  ;;  %v2668_v49 = vmul.f32 %v4806_v47, %v5895_v58  ;;  %v4706_v58 = vld [vmem:[%s5478_s22 + $0x90] sm:$0xff]  }
 0x8ff   : > { %2915 = vmatprep.mubr.bf16.mxu1 %v5123_v46  ;;  %2968 = vmatprep.mubr.bf16.mxu0 %v5123_v46  ;;  %v4699_v46 = vld [vmem:[%s5478_s22 + $0x48] sm:$0xff]  }
 0x900   : > { %v2678_v23 = vmul.f32 %v3934_v62, %v2668_v49  ;;  %4101 = vmatpush3.bf16.msra.mxu1 %v4697_v4  ;;  %4129 = vmatpush3.bf16.msra.mxu0 %v4698_v5 }
 0x901   : > { %4102 = vmatprep.subr.bf16.mxu1 %v4699_v46  ;;  %4130 = vmatprep.subr.bf16.mxu0 %v4700_v6 }
 0x902   : > { %v2680_v19 = vpack.c.bf16 %v2678_v23, %v2677_v1 }
 0x904   : > { %4103 = vmatpush3.bf16.msra.mxu1 %v4701_v8  ;;  %4131 = vmatpush3.bf16.msra.mxu0 %v4702_v56 }
 0x905   : > { %4104 = vmatprep.subr.bf16.mxu1 %v4703_v29  ;;  %4132 = vmatprep.subr.bf16.mxu0 %v4704_v40 }
 0x906   : > { %2916 = vmatmul.mubr.bf16.gmra.mrb[32].mxu1 %v2680_v19  ;;  %2969 = vmatmul.mubr.bf16.gmra.mrb[28].mxu0 %v2680_v19 }
 0x908   : > { %4105 = vmatpush3.bf16.msra.mxu1 %v4705_v10  ;;  %4133 = vmatpush3.bf16.msra.mxu0 %v4706_v58 }
 0x909   : > { %4106 = vmatprep.subr.bf16.mxu1 %v4707_v11  ;;  %4134 = vmatprep.subr.bf16.mxu0 %v4708_v59 }
 0x90c   : > { %4107 = vmatpush3.bf16.msra.mxu1 %v4709_v12  ;;  %4135 = vmatpush3.bf16.msra.mxu0 %v4710_v57 }
 0x90d   : > { %4108 = vmatprep.subr.bf16.mxu1 %v4711_v54  ;;  %4136 = vmatprep.subr.bf16.mxu0 %v4712_v15 }
 0x910   : > { %4109 = vmatpush3.bf16.msra.mxu1 %v4713_v18  ;;  %4137 = vmatpush3.bf16.msra.mxu0 %v4714_v20 }
 0x911   : > { %4110 = vmatprep.subr.bf16.mxu1 %v4715_v21  ;;  %4138 = vmatprep.subr.bf16.mxu0 %v4716_v22 }
 0x914   : > { %4111 = vmatpush3.bf16.msra.mxu1 %v4717_v25  ;;  %4139 = vmatpush3.bf16.msra.mxu0 %v4718_v26 }
 0x915   : > { %4112 = vmatprep.subr.bf16.mxu1 %v4719_v30  ;;  %4140 = vmatprep.subr.bf16.mxu0 %v4720_v33 }
 0x918   : > { %4113 = vmatpush3.bf16.msra.mxu1 %v4721_v34  ;;  %4141 = vmatpush3.bf16.msra.mxu0 %v4722_v9 }
 0x919   : > { %4114 = vmatprep.subr.bf16.mxu1 %v4723_v39  ;;  %4142 = vmatprep.subr.bf16.mxu0 %v4724_v7 }
 0x91c   : > { %4115 = vmatpush3.bf16.msra.mxu1 %v4725_v31  ;;  %4143 = vmatpush3.bf16.msra.mxu0 %v4726_v41 }
 0x9d1   : > { %v5962_v42 = vpop.f32.mrb[28].mxu1  ;;  %v5964_v61 = vpop.f32.mrb[24].mxu0 }
 0x9d2   : > { %v2979_v14 = vmul.f32 %v5962_v42, %v5962_v42  ;;  %v2981_v35 = vmul.f32 %v5964_v61, %v5964_v61  ;;  %v5970_v37 = vpop.f32.mrb[29].mxu1  ;;  %v5972_v32 = vpop.f32.mrb[25].mxu0 }
 0x9d3   : > { %v2980_v28 = vmul.f32 %v5970_v37, %v5970_v37  ;;  %v2982_v48 = vmul.f32 %v5972_v32, %v5972_v32  ;;  %v5978_v50 = vpop.f32.mrb[30].mxu1  ;;  %v5980_v51 = vpop.f32.mrb[26].mxu0 }
 0x9d4   : > { %v2995_v38 = vmul.f32 %v2979_v14, %v5962_v42  ;;  %v2997_v24 = vmul.f32 %v2981_v35, %v5964_v61  ;;  %v2983_v27 = vmul.f32 %v5978_v50, %v5978_v50  ;;  %v2985_v55 = vmul.f32 %v5980_v51, %v5980_v51  ;;  %v5988_v60 = vpop.f32.mrb[31].mxu1  ;;  %v5990_v43 = vpop.f32.mrb[27].mxu0 }
 0x9d5   : > { %v2996_v62 = vmul.f32 %v2980_v28, %v5970_v37  ;;  %v2998_v45 = vmul.f32 %v2982_v48, %v5972_v32  ;;  %v2984_v13 = vmul.f32 %v5988_v60, %v5988_v60  ;;  %v2986_v63 = vmul.f32 %v5990_v43, %v5990_v43 }
 0x9d6   : > { %v3011_v17 = vmul.f32 0.044715, %v2995_v38  ;;  %v3013_v16 = vmul.f32 0.044715, %v2997_v24  ;;  %v2999_v47 = vmul.f32 %v2983_v27, %v5978_v50  ;;  %v3001_v0 = vmul.f32 %v2985_v55, %v5980_v51 }
 0x9d7   : > { %v3012_v49 = vmul.f32 0.044715, %v2996_v62  ;;  %v3014_v23 = vmul.f32 0.044715, %v2998_v45  ;;  %v3000_v1 = vmul.f32 %v2984_v13, %v5988_v60  ;;  %v3002_v19 = vmul.f32 %v2986_v63, %v5990_v43 }
 0x9d8   : > { %v3027_v2 = vadd.f32 %v3011_v17, %v5962_v42  ;;  %v3029_v3 = vadd.f32 %v3013_v16, %v5964_v61  ;;  %v3015_v4 = vmul.f32 0.044715, %v2999_v47  ;;  %v3017_v5 = vmul.f32 0.044715, %v3001_v0 }
 0x9d9   : > { %v3028_v46 = vadd.f32 %v3012_v49, %v5970_v37  ;;  %v3030_v6 = vadd.f32 %v3014_v23, %v5972_v32  ;;  %v3016_v8 = vmul.f32 0.044715, %v3000_v1  ;;  %v3018_v56 = vmul.f32 0.044715, %v3002_v19  ;;  %v6006_v29 = vpop.f32.mrb[32].mxu1  ;;  %v6008_v40 = vpop.f32.mrb[28].mxu0 }
 0x9da   : > { %v3043_v10 = vmul.f32 0.7978846, %v3027_v2  ;;  %v3045_v58 = vmul.f32 0.7978846, %v3029_v3  ;;  %v3031_v11 = vadd.f32 %v3015_v4, %v5978_v50  ;;  %v3033_v59 = vadd.f32 %v3017_v5, %v5980_v51  ;;  %v6012_v12 = vpop.f32.mrb[33].mxu1  ;;  %v6014_v57 = vpop.f32.mrb[29].mxu0 }
 0x9db   : > { %v3044_v54 = vmul.f32 0.7978846, %v3028_v46  ;;  %v3046_v15 = vmul.f32 0.7978846, %v3030_v6  ;;  %v3032_v18 = vadd.f32 %v3016_v8, %v5988_v60  ;;  %v3034_v20 = vadd.f32 %v3018_v56, %v5990_v43  ;;  %v6018_v21 = vpop.f32.mrb[34].mxu1  ;;  %v6020_v22 = vpop.f32.mrb[30].mxu0 }
 0x9dc   : > { %4807 = vtanh.f32 %v3043_v10  ;;  %v3047_v25 = vmul.f32 0.7978846, %v3031_v11  ;;  %v3049_v26 = vmul.f32 0.7978846, %v3033_v59  ;;  %v2987_v30 = vmul.f32 %v6006_v29, %v6006_v29  ;;  %v6024_v33 = vpop.f32.mrb[35].mxu1  ;;  %v6026_v34 = vpop.f32.mrb[31].mxu0 }
 0x9dd   : > { %4809 = vtanh.f32 %v3045_v58  ;;  %v3048_v9 = vmul.f32 0.7978846, %v3032_v18  ;;  %v3050_v39 = vmul.f32 0.7978846, %v3034_v20  ;;  %v2989_v7 = vmul.f32 %v6008_v40, %v6008_v40 }
 0x9de   : > { %4811 = vtanh.f32 %v3044_v54  ;;  %v3003_v31 = vmul.f32 %v2987_v30, %v6006_v29  ;;  %v2988_v41 = vmul.f32 %v6012_v12, %v6012_v12  ;;  %v2990_v14 = vmul.f32 %v6014_v57, %v6014_v57 }
 0x9df   : > { %4813 = vtanh.f32 %v3046_v15  ;;  %v3005_v35 = vmul.f32 %v2989_v7, %v6008_v40  ;;  %v2991_v28 = vmul.f32 %v6018_v21, %v6018_v21  ;;  %v2993_v48 = vmul.f32 %v6020_v22, %v6020_v22 }
 0x9e0   : > { %4815 = vtanh.f32 %v3047_v25  ;;  %v3019_v38 = vmul.f32 0.044715, %v3003_v31  ;;  %v3004_v24 = vmul.f32 %v2988_v41, %v6012_v12  ;;  %v3006_v27 = vmul.f32 %v2990_v14, %v6014_v57 }
 0x9e1   : > { %4817 = vtanh.f32 %v3049_v26  ;;  %v3021_v55 = vmul.f32 0.044715, %v3005_v35  ;;  %v3007_v62 = vmul.f32 %v2991_v28, %v6018_v21  ;;  %v3009_v45 = vmul.f32 %v2993_v48, %v6020_v22 }
 0x9e2   : > { %4819 = vtanh.f32 %v3048_v9  ;;  %v3035_v13 = vadd.f32 %v3019_v38, %v6006_v29  ;;  %v3020_v63 = vmul.f32 0.044715, %v3004_v24  ;;  %v3022_v17 = vmul.f32 0.044715, %v3006_v27 }
 0x9e3   : > { %4821 = vtanh.f32 %v3050_v39  ;;  %v3037_v16 = vadd.f32 %v3021_v55, %v6008_v40  ;;  %v3023_v47 = vmul.f32 0.044715, %v3007_v62  ;;  %v3025_v0 = vmul.f32 0.044715, %v3009_v45 }
 0x9e4   : > { %v3051_v49 = vmul.f32 0.7978846, %v3035_v13  ;;  %v3036_v23 = vadd.f32 %v3020_v63, %v6012_v12  ;;  %v3038_v1 = vadd.f32 %v3022_v17, %v6014_v57  ;;  %v2992_v19 = vmul.f32 %v6024_v33, %v6024_v33 }
 0x9e5   : > { %v3053_v2 = vmul.f32 0.7978846, %v3037_v16  ;;  %v3039_v3 = vadd.f32 %v3023_v47, %v6018_v21  ;;  %v3041_v4 = vadd.f32 %v3025_v0, %v6020_v22  ;;  %v2994_v5 = vmul.f32 %v6026_v34, %v6026_v34 }
 0x9e6   : > { %v4808_v46 = vpop.eup %4807  ;;  %4823 = vtanh.f32 %v3051_v49  ;;  %v3052_v6 = vmul.f32 0.7978846, %v3036_v23  ;;  %v3008_v8 = vmul.f32 %v2992_v19, %v6024_v33  ;;  %v3054_v25 = vmul.f32 0.7978846, %v3038_v1 }
 0x9e7   : > { %v4810_v56 = vpop.eup %4809  ;;  %v3075_v10 = vadd.f32 1.0, %v4808_v46  ;;  %4825 = vtanh.f32 %v3053_v2  ;;  %v3055_v58 = vmul.f32 0.7978846, %v3039_v3  ;;  %v3057_v11 = vmul.f32 0.7978846, %v3041_v4 }
 0x9e8   : > { %v4812_v59 = vpop.eup %4811  ;;  %v3077_v54 = vadd.f32 1.0, %v4810_v56  ;;  %4827 = vtanh.f32 %v3052_v6  ;;  %v3024_v15 = vmul.f32 0.044715, %v3008_v8  ;;  %v3010_v26 = vmul.f32 %v2994_v5, %v6026_v34 }
 0x9e9   : > { %v4814_v18 = vpop.eup %4813  ;;  %v3076_v20 = vadd.f32 1.0, %v4812_v59  ;;  %4829 = vtanh.f32 %v3055_v58  ;;  %v3091_v31 = vmul.f32 0.5, %v3075_v10 }
 0x9ea   : > { %v4816_v30 = vpop.eup %4815  ;;  %v3078_v9 = vadd.f32 1.0, %v4814_v18  ;;  %v3040_v39 = vadd.f32 %v3024_v15, %v6024_v33  ;;  %4831 = vtanh.f32 %v3057_v11  ;;  %v3093_v35 = vmul.f32 0.5, %v3077_v54 }
 0x9eb   : > { %v4818_v7 = vpop.eup %4817  ;;  %v3079_v41 = vadd.f32 1.0, %v4816_v30  ;;  %v3092_v28 = vmul.f32 0.5, %v3076_v20  ;;  %4833 = vtanh.f32 %v3054_v25  ;;  %v3026_v62 = vmul.f32 0.044715, %v3010_v26 }
 0x9ec   : > { %v4820_v14 = vpop.eup %4819  ;;  %v3081_v48 = vadd.f32 1.0, %v4818_v7  ;;  %v3056_v38 = vmul.f32 0.7978846, %v3040_v39  ;;  %v3094_v45 = vmul.f32 0.5, %v3078_v9  ;;  %v3107_v17 = vmul.f32 %v3091_v31, %v5962_v42 }
 0x9ed   : > { %v4822_v24 = vpop.eup %4821  ;;  %v3095_v27 = vmul.f32 0.5, %v3079_v41  ;;  %v3080_v55 = vadd.f32 1.0, %v4820_v14  ;;  %v3042_v0 = vadd.f32 %v3026_v62, %v6026_v34  ;;  %v3109_v23 = vmul.f32 %v3093_v35, %v5964_v61 }
 0x9ee   : > { %v3097_v13 = vmul.f32 0.5, %v3081_v48  ;;  %v3082_v63 = vadd.f32 1.0, %v4822_v24  ;;  %4835 = vtanh.f32 %v3056_v38  ;;  %v3108_v1 = vmul.f32 %v3092_v28, %v5970_v37 }
 0x9ef   : > { %v3111_v16 = vmul.f32 %v3095_v27, %v5978_v50  ;;  %v3096_v47 = vmul.f32 0.5, %v3080_v55  ;;  %v3058_v6 = vmul.f32 0.7978846, %v3042_v0  ;;  %v3110_v50 = vmul.f32 %v3094_v45, %v5972_v32 }
 0x9f0   : > { %v4824_v49 = vpop.eup %4823  ;;  %v3113_v19 = vmul.f32 %v3097_v13, %v5980_v51  ;;  %v3098_v2 = vmul.f32 0.5, %v3082_v63 }
 0x9f1   : > { %v4826_v3 = vpop.eup %4825  ;;  %v3123_v4 = vpack.c.bf16 %v3111_v16, %v3107_v17  ;;  %v3112_v5 = vmul.f32 %v3096_v47, %v5988_v60  ;;  %v3083_v46 = vadd.f32 1.0, %v4824_v49  ;;  %4837 = vtanh.f32 %v3058_v6 }
 0x9f2   : > { %v4828_v42 = vpop.eup %4827  ;;  %v3125_v8 = vpack.c.bf16 %v3113_v19, %v3109_v23  ;;  %v3114_v56 = vmul.f32 %v3098_v2, %v5990_v43  ;;  %v3085_v10 = vadd.f32 1.0, %v4826_v3 }
 0x9f3   : > { %v3124_v61 = vpack.c.bf16 %v3112_v5, %v3108_v1  ;;  %v4830_v58 = vpop.eup %4829  ;;  %v3099_v51 = vmul.f32 0.5, %v3083_v46  ;;  %v3084_v59 = vadd.f32 1.0, %v4828_v42 }
 0x9f4   : > { %v3126_v37 = vpack.c.bf16 %v3114_v56, %v3110_v50  ;;  %v4832_v11 = vpop.eup %4831  ;;  %v3087_v54 = vadd.f32 1.0, %v4830_v58  ;;  %v3101_v15 = vmul.f32 0.5, %v3085_v10 }
 0x9f5   : > { %3419 = vmatprep.mubr.bf16.mxu1 %v3124_v61  ;;  %v3089_v60 = vadd.f32 1.0, %v4832_v11  ;;  %v4834_v18 = vpop.eup %4833  ;;  %v3115_v43 = vmul.f32 %v3099_v51, %v6006_v29  ;;  %v3100_v26 = vmul.f32 0.5, %v3084_v59 }
 0x9f6   : > { %3468 = vmatprep.mubr.bf16.mxu0 %v3126_v37  ;;  %3420 = vmatmul.mubr.bf16.vlgmr.msra.gmra.mrb[36].mxu1 %v3123_v4  ;;  %v3103_v20 = vmul.f32 0.5, %v3087_v54  ;;  %v3117_v39 = vmul.f32 %v3101_v15, %v6008_v40  ;;  %v3086_v7 = vadd.f32 1.0, %v4834_v18 }
 0x9f7   : > { %3469 = vmatmul.mubr.bf16.vlgmr.msra.gmra.mrb[32].mxu0 %v3125_v8  ;;  %v3105_v25 = vmul.f32 0.5, %v3089_v60  ;;  %v3116_v48 = vmul.f32 %v3100_v26, %v6012_v12 }
 0x9f8   : > { %v4836_v32 = vpop.eup %4835  ;;  %v3119_v30 = vmul.f32 %v3103_v20, %v6018_v21  ;;  %v3102_v24 = vmul.f32 0.5, %v3086_v7  ;;  %v4844_v7 = vld [vmem:[#allocation12 + $0x8] sm:$0xff] (!%p3999_p8)  }
 0x9f9   : > { %v3088_v9 = vadd.f32 1.0, %v4836_v32  ;;  %v3121_v31 = vmul.f32 %v3105_v25, %v6020_v22 }
 0x9fa   : > { %v3127_v14 = vpack.c.bf16 %v3119_v30, %v3115_v43  ;;  %v3118_v21 = vmul.f32 %v3102_v24, %v6014_v57 }
 0x9fb   : > { %v3104_v41 = vmul.f32 0.5, %v3088_v9  ;;  %v3129_v35 = vpack.c.bf16 %v3121_v31, %v3117_v39  ;;  %v4838_v28 = vpop.eup %4837  ;;  %v4843_v9 = vld [vmem:[#allocation12] sm:$0xff] (!%p3999_p8)   ;;  %v5128_v39 = vmov (!%p3999_p8), 0.0   ;;  %v4845_v31 = vld [vmem:[#allocation12 + $0x10] sm:$0xff] (!%p3999_p8)  }
 0x9fc   : > { %v3090_v27 = vadd.f32 1.0, %v4838_v28  ;;  %4317 = vmatprep.subr.bf16.mxu0 (!%p3999_p8), %v5128_v39  ;;  %v4849_v28 = vld [vmem:[#allocation12 + $0x30] sm:$0xff] (!%p3999_p8)  }
 0x9fd   : > { %v3120_v38 = vmul.f32 %v3104_v41, %v6024_v33  ;;  %4318 = vmatpush3.bf16.msra.mxu0 (!%p3999_p8), %v4843_v9  ;;  %v4846_v41 = vld [vmem:[#allocation12 + $0x18] sm:$0xff] (!%p3999_p8)  }
 0x9fe   : > { %v3106_v55 = vmul.f32 0.5, %v3090_v27  ;;  %4319 = vmatprep.subr.bf16.mxu0 (!%p3999_p8), %v5128_v39 }
 0x9ff   : > { %v3128_v29 = vpack.c.bf16 %v3120_v38, %v3116_v48  ;;  %v4850_v48 = vld [vmem:[#allocation12 + $0x38] sm:$0xff] (!%p3999_p8)  }
 0xa00   : > { %v3122_v40 = vmul.f32 %v3106_v55, %v6026_v34 }
 0xa01   : > { %3427 = vmatprep.mubr.bf16.mxu1 %v3128_v29  ;;  %4320 = vmatpush3.bf16.msra.mxu0 (!%p3999_p8), %v4844_v7 }
 0xa02   : > { %3428 = vmatmul.mubr.bf16.gmra.mrb[40].mxu1 %v3127_v14  ;;  %v3130_v62 = vpack.c.bf16 %v3122_v40, %v3118_v21  ;;  %4321 = vmatprep.subr.bf16.mxu0 (!%p3999_p8), %v5128_v39  ;;  %v4847_v14 = vld [vmem:[#allocation12 + $0x20] sm:$0xff] (!%p3999_p8)  }
 0xa04   : > { %3476 = vmatprep.mubr.bf16.mxu0 %v3130_v62 }
 0xa05   : > { %3477 = vmatmul.mubr.bf16.gmra.mrb[36].mxu0 %v3129_v35  ;;  %v4848_v35 = vld [vmem:[#allocation12 + $0x28] sm:$0xff] (!%p3999_p8)  }
 0xa06   : > { %4322 = vmatpush3.bf16.msra.mxu0 (!%p3999_p8), %v4845_v31  ;;  %4333 = vmatprep.mubr.msk.bf16.mxu0 (!%p3999_p8), %vm5129_vm9, %v5128_v39 }
 0xa07   : > { %4323 = vmatprep.subr.bf16.mxu0 (!%p3999_p8), %v5128_v39 }
 0xa0a   : > { %4324 = vmatpush3.bf16.msra.mxu0 (!%p3999_p8), %v4846_v41 }
 0xa0b   : > { %4325 = vmatprep.subr.bf16.mxu0 (!%p3999_p8), %v5128_v39 }
 0xa0e   : > { %4326 = vmatpush3.bf16.msra.mxu0 (!%p3999_p8), %v4847_v14 }
 0xa0f   : > { %4327 = vmatprep.subr.bf16.mxu0 (!%p3999_p8), %v5128_v39 }
 0xa12   : > { %4328 = vmatpush3.bf16.msra.mxu0 (!%p3999_p8), %v4848_v35 }
 0xa13   : > { %4329 = vmatprep.subr.bf16.mxu0 (!%p3999_p8), %v5128_v39 }
 0xa16   : > { %4330 = vmatpush3.bf16.msra.mxu0 (!%p3999_p8), %v4849_v28 }
 0xa17   : > { %4331 = vmatprep.subr.bf16.mxu0 (!%p3999_p8), %v5128_v39 }
 0xa1a   : > { %4332 = vmatpush3.bf16.msra.mxu0 (!%p3999_p8), %v4850_v48 }
 0xac9   : > { %v4116_v22 = vpop.f32.mrb[36].mxu1 }
 0xaca   : > { %v4144_v45 = vpop.f32.mrb[32].mxu0  ;;  %v4117_v13 = vpop.f32.mrb[37].mxu1 }
 0xacb   : > { %v4118_v63 = vadd.f32 %v4117_v13, %v4116_v22  ;;  %v4145_v12 = vpop.f32.mrb[33].mxu0  ;;  %v4119_v17 = vpop.f32.mrb[38].mxu1  ;;  %v4000_v22 = vld [vmem:[%s6174_s16] ss:$0 sm:$0xff] (!%p3999_p8) }
 0xacc   : > { %v4146_v33 = vadd.f32 %v4145_v12, %v4144_v45  ;;  %v4147_v16 = vpop.f32.mrb[34].mxu0  ;;  %v4120_v47 = vpop.f32.mrb[39].mxu1 }
 0xacd   : > { %v4121_v0 = vadd.f32 %v4120_v47, %v4119_v17  ;;  %v4148_v49 = vpop.f32.mrb[35].mxu0 }
 0xace   : > { %v3471_v23 = vadd.f32 %v4146_v33, %v4118_v63  ;;  %v4149_v1 = vadd.f32 %v4148_v49, %v4147_v16 }
 0xad0   : > { %v3485_v57 = vadd.f32 %v3471_v23, %v5855_v44  ;;  %v3474_v34 = vadd.f32 %v4149_v1, %v4121_v0 }
 0xad2   : > { %3489 = vst [vmem:[#allocation2] sm:$0xff] %v3485_v57  ;;  %v3486_v19 = vadd.f32 %v3474_v34, %v5857_v36 }
 0xad4   : > { %3490 = vst [vmem:[#allocation2 + $0x8] sm:$0xff] %v3486_v19  ;;  %v3504_v59 = vsel (!%p3999_p8), %vm3503_vm8, %v3486_v19, 0.0 }
 0xad5   : > { %v4122_v2 = vpop.f32.mrb[40].mxu1 }
 0xad6   : > { %v4123_v3 = vpop.f32.mrb[41].mxu1 }
 0xad7   : > { %v4124_v4 = vadd.f32 %v4123_v3, %v4122_v2  ;;  %v4125_v5 = vpop.f32.mrb[42].mxu1 }
 0xad8   : > { %v4126_v46 = vpop.f32.mrb[43].mxu1  ;;  %v4150_v42 = vpop.f32.mrb[36].mxu0 }
 0xad9   : > { %v4127_v6 = vadd.f32 %v4126_v46, %v4125_v5  ;;  %v4151_v50 = vpop.f32.mrb[37].mxu0 }
 0xada   : > { %v4152_v8 = vadd.f32 %v4151_v50, %v4150_v42  ;;  %v4153_v56 = vpop.f32.mrb[38].mxu0 }
 0xadb   : > { %v4154_v10 = vpop.f32.mrb[39].mxu0 }
 0xadc   : > { %v3479_v61 = vadd.f32 %v4152_v8, %v4124_v4  ;;  %v4155_v58 = vadd.f32 %v4154_v10, %v4153_v56  ;;  %3496 = sbr.rel (%p3999_p8) target bundleno = 3331 (0xd03), region = 88 }
 0xade   : > { %v3487_v44 = vadd.f32 %v3479_v61, %v5860_v52  ;;  %v3482_v37 = vadd.f32 %v4155_v58, %v4127_v6 }
 0xae0   : > { %3491 = vst [vmem:[#allocation2 + $0x10] sm:$0xff] %v3487_v44  ;;  %v3488_v36 = vadd.f32 %v3482_v37, %v5864_v53 }
 0xae2   : > { %3492 = vst [vmem:[#allocation2 + $0x18] sm:$0xff] %v3488_v36  ;;  %v3500_v11 = vrot.slane (!%p3999_p8), %v3488_v36, 7 }
 0xae4   : > { %v3508_v51 = vsel %vm3507_vm7, %v3500_v11, 0.0 }
 0xae5   : > { %3509 = vadd.xlane.f32.xlu0 %v3508_v51 }
 0xae9   : > { %3505 = vadd.xlane.f32.xlu0 %v3504_v59 }
 0xb72   : > { %v3510_v54 = vpop.xlane.xlu0 %3509 }
 0xb73   : > { %v3512_v15 = vmul.f32 0.0078125, %v3510_v54 }
 0xb75   : > { %v3515_v52 = vrot.slane %v3512_v15, 1 }
 0xb76   : > { %v3506_v60 = vpop.xlane.xlu0 %3505 }
 0xb77   : > { %v3519_v18 = vsub.f32 %v3488_v36, %v3515_v52  ;;  %v3511_v20 = vmul.f32 0.0078125, %v3506_v60 }
 0xb79   : > { %v3518_v53 = vsub.f32 %v3486_v19, %v3511_v20  ;;  %v3521_v32 = vmul.f32 %v3519_v18, %v3519_v18 }
 0xb7b   : > { %v3520_v25 = vmul.f32 %v3518_v53, %v3518_v53  ;;  %v3524_v43 = vrot.slane %v3521_v32, 7 }
 0xb7d   : > { %v3530_v26 = vsel %vm3507_vm7, %v3524_v43, 0.0  ;;  %v3527_v30 = vsel %vm3503_vm8, %v3520_v25, 0.0 }
 0xb7e   : > { %3531 = vadd.xlane.f32.xlu1 %v3530_v26 }
 0xb82   : > { %3528 = vadd.xlane.f32.xlu1 %v3527_v30 }
 0xc0b   : > { %v3532_v38 = vpop.xlane.xlu1 %3531 }
 0xc0c   : > { %v3534_v24 = vmul.f32 0.0078125, %v3532_v38 }
 0xc0e   : > { %v3536_v27 = vadd.f32 1e-05, %v3534_v24 }
 0xc0f   : > { %v3529_v29 = vpop.xlane.xlu1 %3528 }
 0xc10   : > { %4851 = vrsqrt.f32 %v3536_v27  ;;  %v3533_v55 = vmul.f32 0.0078125, %v3529_v29 }
 0xc12   : > { %v3535_v21 = vadd.f32 1e-05, %v3533_v55 }
 0xc14   : > { %4853 = vrsqrt.f32 %v3535_v21 }
 0xc1a   : > { %v4852_v40 = vpop.eup %4851 }
 0xc1b   : > { %v3541_v62 = vrot.slane %v4852_v40, 1 }
 0xc1d   : > { %v3545_v45 = vmul.f32 %v3541_v62, %v3519_v18 }
 0xc1e   : > { %v4854_v13 = vpop.eup %4853 }
 0xc1f   : > { %v3553_v63 = vmul.f32 %v4000_v22, %v3545_v45  ;;  %v3544_v12 = vmul.f32 %v4854_v13, %v3518_v53 }
 0xc21   : > { %v3555_v17 = vpack.c.bf16 %v3553_v63, %v3553_v63  ;;  %v3552_v33 = vmul.f32 %v4000_v22, %v3544_v12 }
 0xc23   : > { %v3554_v16 = vpack.c.bf16 %v3552_v33, %v3552_v33  ;;  %v3575_v47 = vunpack.c.l.b16 %v3555_v17 }
 0xc25   : > { %v3574_v0 = vunpack.c.l.b16 %v3554_v16  ;;  %v3577_v23 = vrot.slane %v3575_v47, 6 }
 0xc27   : > { %v3576_v49 = vrot.slane %v3574_v0, 7 }
 0xc29   : > { %v3579_v1 = vsel %vm3578_vm10, %v3577_v23, %v3576_v49 }
 0xc2a   : > { %v3580_v57 = vpack.c.b16 %v3579_v1, %v3579_v1 }
 0xc2c   : > { %4334 = vmatmul.mubr.bf16.vlgmr.msra.gmra.mrb[0].mxu0 %v3580_v57 }
 0xcff   : > { %v3664_v34 = vpop.f32.mrb[0].mxu0 }
 0xd00   : > { %3670 = vst [vmem:[#allocation14] sm:$0x3] %v3664_v34  ;;  %v4335_v19 = vpop.f32.mrb[1].mxu0 }
 0xd01   : > { %v3667_v2 = vpop.f32.mrb[2].mxu0 }
 0xd02   : > { %v4336_v3 = vpop.f32.mrb[3].mxu0 }
 0xd03 PF: > { %p4465_p7 = scmp.eq.s32.totalorder %s5315_s28, 1  ;;  %s5130_s2 = smov [#allocation14]  }
 0xd04   : > { %s3678_s21 = sshll.u32 %s5130_s2, 4  ;;  %s3679_s21 = int_to_ptr.vmem [resolvable:$true] %s3678_s21 }
 0xd05   : > { %s5031_s4 = scalar_lea.vmem %s3679_s21, 32  ;;  %p5038_p1 = scmp.lt.s32.totalorder %s3679_s21, %s3679_s21 }
 0xd06   : > { %p5032_p2 = scmp.ne.s32.totalorder %s3679_s21, %s5031_s4  ;;  %p5039_p0 = scmp.lt.s32.totalorder %s5031_s4, %s5031_s4 }
 0xd08   : > { %p5033_p6 = pnand %p5032_p2, %p4465_p7  ;;  %p5040_p10 = por %p5039_p0, %p5038_p1 }
 0xd0a   : > { %p5034_p12 = pneg %p5033_p6 }
 0xd0c   : > { %p5041_p13 = pnand %p5040_p10, %p5034_p12 }
 0xd0e   : > { %5044 = shalt.err (!%p5041_p13)
}
 0xd0f   : > { %s6175_s11 = sld [smem:[#allocation27_spill]] }
 0xd15   : > { %s6176_s13 = smov %s6175_s11  ;;  %s5045_s26 = scalar_lea.hbm %s6175_s11, 32 }
 0xd16   : > { %p5046_p3 = scmp.ne.s32.totalorder %s6176_s13, %s5045_s26  ;;  %p5051_p11 = scmp.lt.u32.totalorder %s5045_s26, %s6176_s13 }
 0xd18   : > { %p5047_p5 = pnand %p5046_p3, %p4465_p7 }
 0xd1a   : > { %p5048_p4 = pneg %p5047_p5 }
 0xd1c   : > { %p5053_p9 = pnand %p5051_p11, %p5048_p4 }
 0xd1e   : > { %5056 = shalt.err (!%p5053_p9)
}
 0xd1f   : > { %4437 = dma.vmem_to_hbm [thread:$0]  (%p4465_p7), %s3679_s21, 32, %s6176_s13, [#allocation5]  }
 0xd20   : > { %5090 = dma.done.wait (%p4465_p7), [#allocation5], 32  }
 0xd21   : > { %5092 = vsyncadd (%p4465_p7), [#allocation5], 4294967264 }
 0xd22 PF: > { %s6177_s12 = sld [smem:[#allocation21_spill]]  ;;  %s6178_s27 = sld [smem:[#allocation20_spill]] }
 0xd23   : > { %s6179_s11 = sld [smem:[#allocation22_spill]]  ;;  %s6180_s30 = smov %s5099_s10 }
 0xd28   : > { %p25_p8 = scmp.ge.s32.totalorder %s6177_s12, 4   ;;  %s6181_s10 = smov %s6178_s27 }
 0xd2a   :  { %27 = sbr.rel (!%p25_p8) target bundleno = 14 (0xe), region = 151 }
 0xd31   :  { %3691 = vsyncpa [#allocation4], 1 }
 0xd32   :  { %3693 = vsyncpa [#allocation4 + $0x1], 1 }
 0xd33   :  { %3694 = vsyncpa [#allocation7], 1 }
 0xd34   :  { %3696 = vsyncpa [#allocation7 + $0x1], 1 }
 0xd35   :  { %3697 = vsyncpa [#allocation10], 1 }
 0xd36   :  { %3699 = vsyncpa [#allocation10 + $0x1], 1 }
 0xd37   :  { %3700 = vsyncpa [#allocation13], 1 }
 0xd38   :  { %3701 = vsyncpa [#allocation5], 1 }
 0xd39   :  { %3703 = vsyncpa [#allocation5 + $0x1], 1 }

</bundles_post_ra>
